<compile_context>
chip_gen: v7x
topology: tpu7x:2x2x1
jax: 0.10.0
libtpu: 0.0.40
codegen_flags: <defaults>
</compile_context>

<pallas_src>
import jax
import jax.numpy as jnp
from jax import lax
from jax.experimental import pallas as pl
from jax.experimental.pallas import tpu as pltpu

SOS_TOKEN = 1
MAX_LENGTH = 8  # the reference uses an (undefined) global `max_length`
NEG_BIG = -1e30


def decoder_kernel(enc_hid_ref, emb_ref, wih_ref, bih_ref, whh_ref, bhh_ref,
                   wout_ref, bout_ref, out_ref, hid_ref, tok_ref):
    # out_ref   : (1, Bp, Vp)  per-step log-prob block (streamed back every grid step)
    # hid_ref   : (2, Bp, Hp)  resident across the whole grid (carried hidden state)
    # tok_ref   : (Bp, 1) i32  VMEM scratch carrying the greedy token across grid steps
    t = pl.program_id(0)
    _, Bp, Vp = out_ref.shape
    Hp = hid_ref.shape[2]          # lane-padded hidden width == per-gate lane stride

    @pl.when(t == 0)
    def _init():
        hid_ref[...] = enc_hid_ref[...]
        tok_ref[...] = jnp.full(tok_ref.shape, SOS_TOKEN, jnp.int32)

    iota_v = lax.broadcasted_iota(jnp.int32, (Bp, Vp), 1)        # (Bp, Vp)
    tok = tok_ref[...]                                           # (Bp, 1) i32

    # embedding lookup of the data-dependent token via lane-dense one-hot matmul + ReLU
    onehot = (iota_v == tok).astype(jnp.float32)                 # (Bp, Vp)
    x = jnp.dot(onehot, emb_ref[...], preferred_element_type=jnp.float32)  # (Bp, Hp)
    x = jnp.maximum(x, 0.0)

    # fused input-gate matmul for both directions; every gate block is Hp(=128k)-lane aligned
    gx = jnp.dot(x, wih_ref[...], preferred_element_type=jnp.float32) + bih_ref[...]  # (Bp, 6Hp)

    def gru_dir(d, off):
        h = hid_ref[d]                                                          # (Bp, Hp)
        gh = jnp.dot(h, whh_ref[d], preferred_element_type=jnp.float32) + bhh_ref[d]  # (Bp, 3Hp)
        r = jax.nn.sigmoid(gx[:, off          : off + Hp]     + gh[:, :Hp])
        z = jax.nn.sigmoid(gx[:, off + Hp     : off + 2 * Hp] + gh[:, Hp:2 * Hp])
        n = jnp.tanh(      gx[:, off + 2 * Hp : off + 3 * Hp] + r * gh[:, 2 * Hp:])
        return (1.0 - z) * n + z * h

    h_f = gru_dir(0, 0)
    h_b = gru_dir(1, 3 * Hp)
    hid_ref[0, :, :] = h_f
    hid_ref[1, :, :] = h_b

    # output projection: two accumulated K=Hp dots (no lane-axis concat on the critical path)
    logits = (jnp.dot(h_f, wout_ref[0], preferred_element_type=jnp.float32)
              + jnp.dot(h_b, wout_ref[1], preferred_element_type=jnp.float32)
              + bout_ref[...])                                                  # (Bp, Vp)

    # log_softmax over vocab (pad cols pinned to -1e30 -> exp underflows to 0)
    mx = jnp.max(logits, axis=-1, keepdims=True)
    sh = logits - mx
    logp = sh - jnp.log(jnp.sum(jnp.exp(sh), axis=-1, keepdims=True))
    out_ref[0, :, :] = logp

    # greedy next token: first-occurrence argmax (pad vocab cols can never win)
    nxt = jnp.min(jnp.where(logits == mx, iota_v, Vp), axis=-1, keepdims=True)
    tok_ref[...] = nxt.astype(jnp.int32)


def make_params(key, hidden_size, output_size):
    H, V = hidden_size, output_size
    ks = jax.random.split(key, 7)
    s = 1.0 / float(H) ** 0.5
    return dict(
        emb=jax.random.normal(ks[0], (V, H), jnp.float32),
        w_ih=jax.random.uniform(ks[1], (2, 3 * H, H), jnp.float32, -s, s),
        w_hh=jax.random.uniform(ks[2], (2, 3 * H, H), jnp.float32, -s, s),
        b_ih=jax.random.uniform(ks[3], (2, 3 * H), jnp.float32, -s, s),
        b_hh=jax.random.uniform(ks[4], (2, 3 * H), jnp.float32, -s, s),
        w_out=jax.random.uniform(ks[5], (V, 2 * H), jnp.float32, -s, s),
        b_out=jax.random.uniform(ks[6], (V,), jnp.float32, -s, s),
    )


def decoder_rnn_forward(encoder_outputs, encoder_hidden, params, max_length=MAX_LENGTH):
    B = encoder_outputs.shape[0]            # only batch size is used, as in PyTorch
    emb = params["emb"]
    V, H = emb.shape
    f32 = jnp.float32

    Vp = ((V + 127) // 128) * 128           # lane-dense vocab
    Hp = ((H + 127) // 128) * 128           # lane-dense hidden / per-gate lane stride
    Bp = ((B + 7) // 8) * 8                 # sublane-dense batch

    # --- parameter packing / padding (wrapper-side, one-time; gate blocks 128-lane aligned) ---
    emb_p = jnp.zeros((Vp, Hp), f32).at[:V, :H].set(emb)
    wih_p = jnp.zeros((Hp, 6 * Hp), f32)
    bih_p = jnp.zeros((1, 6 * Hp), f32)
    whh_p = jnp.zeros((2, Hp, 3 * Hp), f32)
    bhh_p = jnp.zeros((2, 1, 3 * Hp), f32)
    for d in range(2):
        for g in range(3):                   # PyTorch GRU gate order: r, z, n
            c_ih = (3 * d + g) * Hp
            c_hh = g * Hp
            w_ih_g = params["w_ih"][d, g * H:(g + 1) * H, :]   # (H, H)
            w_hh_g = params["w_hh"][d, g * H:(g + 1) * H, :]   # (H, H)
            wih_p = wih_p.at[:H, c_ih:c_ih + H].set(w_ih_g.T)
            bih_p = bih_p.at[0, c_ih:c_ih + H].set(params["b_ih"][d, g * H:(g + 1) * H])
            whh_p = whh_p.at[d, :H, c_hh:c_hh + H].set(w_hh_g.T)
            bhh_p = bhh_p.at[d, 0, c_hh:c_hh + H].set(params["b_hh"][d, g * H:(g + 1) * H])

    wout_p = jnp.zeros((2, Hp, Vp), f32)
    for d in range(2):
        wout_p = wout_p.at[d, :H, :V].set(params["w_out"][:, d * H:(d + 1) * H].T)
    bout_p = jnp.full((1, Vp), NEG_BIG, f32).at[0, :V].set(params["b_out"])

    enc_hid_p = jnp.zeros((2, Bp, Hp), f32).at[:, :B, :H].set(encoder_hidden)

    # --- VMEM budget derived from the actual resident buffers (inputs double-buffered) ---
    in_bytes = sum(int(a.size) * a.dtype.itemsize
                   for a in (enc_hid_p, emb_p, wih_p, bih_p, whh_p, bhh_p, wout_p, bout_p))
    out_bytes = (Bp * Vp + 2 * Bp * Hp) * 4
    vmem_limit = int(min(32 << 20, max(4 << 20, 2 * in_bytes + 4 * out_bytes + (1 << 20))))

    out_tbv, hid = pl.pallas_call(
        decoder_kernel,
        out_shape=(
            jax.ShapeDtypeStruct((max_length, Bp, Vp), f32),
            jax.ShapeDtypeStruct((2, Bp, Hp), f32),
        ),
        grid_spec=pltpu.PrefetchScalarGridSpec(
            num_scalar_prefetch=0,
            grid=(max_length,),
            in_specs=[
                pl.BlockSpec((2, Bp, Hp), lambda t: (0, 0, 0)),       # encoder_hidden (padded)
                pl.BlockSpec((Vp, Hp), lambda t: (0, 0)),             # embedding (padded)
                pl.BlockSpec((Hp, 6 * Hp), lambda t: (0, 0)),         # fused W_ih^T (gate-aligned)
                pl.BlockSpec((1, 6 * Hp), lambda t: (0, 0)),          # fused b_ih
                pl.BlockSpec((2, Hp, 3 * Hp), lambda t: (0, 0, 0)),   # W_hh^T (gate-aligned)
                pl.BlockSpec((2, 1, 3 * Hp), lambda t: (0, 0, 0)),    # b_hh
                pl.BlockSpec((2, Hp, Vp), lambda t: (0, 0, 0)),       # W_out^T per direction
                pl.BlockSpec((1, Vp), lambda t: (0, 0)),              # b_out (pad cols = -1e30)
            ],
            out_specs=[
                pl.BlockSpec((1, Bp, Vp), lambda t: (t, 0, 0)),       # streamed per-step log-probs
                pl.BlockSpec((2, Bp, Hp), lambda t: (0, 0, 0)),       # resident hidden state
            ],
            scratch_shapes=[
                pltpu.VMEM((Bp, 1), jnp.int32),                       # carried greedy token
            ],
        ),
        compiler_params=pltpu.CompilerParams(
            dimension_semantics=("arbitrary",),
            vmem_limit_bytes=vmem_limit,
        ),
    )(enc_hid_p, emb_p, wih_p, bih_p, whh_p, bhh_p, wout_p, bout_p)

    decoder_outputs = jnp.transpose(out_tbv[:, :B, :V], (1, 0, 2))    # (B, T, V) batch_first
    decoder_hidden = hid[:, :B, :H]
    return decoder_outputs, decoder_hidden, None


def reference_forward(encoder_outputs, encoder_hidden, params, max_length=MAX_LENGTH):
    """Pure-JAX reference replicating the same math (greedy decode, target_tensor=None)."""
    B = encoder_outputs.shape[0]
    emb = params["emb"]
    V, H = emb.shape
    w_ih, w_hh = params["w_ih"], params["w_hh"]
    b_ih, b_hh = params["b_ih"], params["b_hh"]
    w_out, b_out = params["w_out"], params["b_out"]

    tok = jnp.full((B,), SOS_TOKEN, jnp.int32)
    hid = encoder_hidden
    outs = []
    for _ in range(max_length):
        x = jnp.maximum(emb[tok], 0.0)
        new_h = []
        for d in range(2):
            h = hid[d]
            gx = x @ w_ih[d].T + b_ih[d]
            gh = h @ w_hh[d].T + b_hh[d]
            r = jax.nn.sigmoid(gx[:, :H] + gh[:, :H])
            z = jax.nn.sigmoid(gx[:, H:2 * H] + gh[:, H:2 * H])
            n = jnp.tanh(gx[:, 2 * H:] + r * gh[:, 2 * H:])
            new_h.append((1.0 - z) * n + z * h)
        hid = jnp.stack(new_h)
        logits = jnp.concatenate(new_h, -1) @ w_out.T + b_out
        outs.append(jax.nn.log_softmax(logits, -1))
        tok = jnp.argmax(logits, -1).astype(jnp.int32)
    return jnp.stack(outs, 1), hid


if __name__ == "__main__":
    B, H, V, T_ENC = 2, 32, 16, 8
    key = jax.random.PRNGKey(0)
    k_enc, k_hid, k_par = jax.random.split(key, 3)

    encoder_outputs = jax.random.normal(k_enc, (B, T_ENC, 2 * H), jnp.float32)
    encoder_hidden = jax.random.normal(k_hid, (2, B, H), jnp.float32)
    params = make_params(k_par, H, V)

    logp, hid, _ = decoder_rnn_forward(encoder_outputs, encoder_hidden, params)
    jax.block_until_ready((logp, hid))

    ref_logp, ref_hid = reference_forward(encoder_outputs, encoder_hidden, params)
    assert logp.shape == (B, MAX_LENGTH, V) and hid.shape == (2, B, H)
    assert jnp.allclose(logp, ref_logp, atol=1e-4, rtol=1e-4), "log-prob mismatch"
    assert jnp.allclose(hid, ref_hid, atol=1e-4, rtol=1e-4), "hidden mismatch"

    print("KERNEL_OK")
</pallas_src>

<mosaic_0001>
module attributes {stable_mosaic.version = 11 : i64} {
  func.func @decoder_kernel(%arg0: i32, %arg1: memref<2x8x128xf32, #tpu.memory_space<vmem>>, %arg2: memref<128x128xf32, #tpu.memory_space<vmem>>, %arg3: memref<128x768xf32, #tpu.memory_space<vmem>>, %arg4: memref<1x768xf32, #tpu.memory_space<vmem>>, %arg5: memref<2x128x384xf32, #tpu.memory_space<vmem>>, %arg6: memref<2x1x384xf32, #tpu.memory_space<vmem>>, %arg7: memref<2x128x128xf32, #tpu.memory_space<vmem>>, %arg8: memref<1x128xf32, #tpu.memory_space<vmem>>, %arg9: memref<1x8x128xf32, #tpu.memory_space<vmem>>, %arg10: memref<2x8x128xf32, #tpu.memory_space<vmem>>, %arg11: memref<8x1xi32, #tpu.memory_space<vmem>>) attributes {dimension_semantics = [#tpu.dimension_semantics<arbitrary>], iteration_bounds = array<i64: 8>, scalar_prefetch = 0 : i64, scratch_operands = 1 : i64, tpu.core_type = #tpu.core_type<tc>, window_params = [{pipeline_mode = #tpu.pipeline_mode<synchronous>, transform_indices = @transform_0, window_bounds = array<i64: 2, 8, 128>}, {pipeline_mode = #tpu.pipeline_mode<synchronous>, transform_indices = @transform_1, window_bounds = array<i64: 128, 128>}, {pipeline_mode = #tpu.pipeline_mode<synchronous>, transform_indices = @transform_2, window_bounds = array<i64: 128, 768>}, {pipeline_mode = #tpu.pipeline_mode<synchronous>, transform_indices = @transform_3, window_bounds = array<i64: 1, 768>}, {pipeline_mode = #tpu.pipeline_mode<synchronous>, transform_indices = @transform_4, window_bounds = array<i64: 2, 128, 384>}, {pipeline_mode = #tpu.pipeline_mode<synchronous>, transform_indices = @transform_5, window_bounds = array<i64: 2, 1, 384>}, {pipeline_mode = #tpu.pipeline_mode<synchronous>, transform_indices = @transform_6, window_bounds = array<i64: 2, 128, 128>}, {pipeline_mode = #tpu.pipeline_mode<synchronous>, transform_indices = @transform_7, window_bounds = array<i64: 1, 128>}, {transform_indices = @transform_8, window_bounds = array<i64: 1, 8, 128>}, {pipeline_mode = #tpu.pipeline_mode<synchronous>, transform_indices = @transform_9, window_bounds = array<i64: 2, 8, 128>}]} {
    %c0_i32 = arith.constant 0 : i32
    %0 = arith.cmpi eq, %arg0, %c0_i32 : i32
    %1 = arith.extui %0 : i1 to i32
    %c0_i32_0 = arith.constant 0 : i32
    %2 = arith.cmpi ne, %1, %c0_i32_0 : i32
    scf.if %2 {
      %c0_59 = arith.constant 0 : index
      %c0_60 = arith.constant 0 : index
      %c0_61 = arith.constant 0 : index
      %124 = vector.load %arg1[%c0_59, %c0_60, %c0_61] : memref<2x8x128xf32, #tpu.memory_space<vmem>>, vector<2x8x128xf32>
      %c0_62 = arith.constant 0 : index
      %c0_63 = arith.constant 0 : index
      %c0_64 = arith.constant 0 : index
      %125 = vector.load %arg10[%c0_62, %c0_63, %c0_64] : memref<2x8x128xf32, #tpu.memory_space<vmem>>, vector<2x8x128xf32>
      tpu.vector_store %arg10[%c0_62, %c0_63, %c0_64], %124 {strides = array<i32>} : memref<2x8x128xf32, #tpu.memory_space<vmem>>, vector<2x8x128xf32>,
      %c1_i32 = arith.constant 1 : i32
      %126 = vector.broadcast %c1_i32 : i32 to vector<8x1xi32>
      %c0_65 = arith.constant 0 : index
      %c0_66 = arith.constant 0 : index
      %127 = vector.load %arg11[%c0_65, %c0_66] : memref<8x1xi32, #tpu.memory_space<vmem>>, vector<8x1xi32>
      tpu.vector_store %arg11[%c0_65, %c0_66], %126 {strides = array<i32>} : memref<8x1xi32, #tpu.memory_space<vmem>>, vector<8x1xi32>,
    } else {
    }
    %3 = tpu.iota {dimensions = array<i32: 1>} : vector<8x128xi32>
    %c0 = arith.constant 0 : index
    %c0_1 = arith.constant 0 : index
    %4 = vector.load %arg11[%c0, %c0_1] : memref<8x1xi32, #tpu.memory_space<vmem>>, vector<8x1xi32>
    %5 = vector.broadcast %4 : vector<8x1xi32> to vector<8x128xi32>
    %6 = arith.cmpi eq, %3, %5 : vector<8x128xi32>
    %7 = arith.extui %6 : vector<8x128xi1> to vector<8x128xi32>
    %8 = arith.sitofp %7 : vector<8x128xi32> to vector<8x128xf32>
    %c0_2 = arith.constant 0 : index
    %c0_3 = arith.constant 0 : index
    %9 = vector.load %arg2[%c0_2, %c0_3] : memref<128x128xf32, #tpu.memory_space<vmem>>, vector<128x128xf32>
    %cst = arith.constant dense<0.000000e+00> : vector<8x128xf32>
    %10 = tpu.matmul %8, %9, %cst {dimension_numbers = #tpu.dot_dimension_numbers<[1], [0], [0], [1], [0, 0, 1, 1], [], []>} : vector<8x128xf32>, vector<128x128xf32>, vector<8x128xf32> -> vector<8x128xf32>
    %cst_4 = arith.constant 0.000000e+00 : f32
    %11 = vector.broadcast %cst_4 : f32 to vector<8x128xf32>
    %12 = arith.maximumf %10, %11 : vector<8x128xf32>
    %c0_5 = arith.constant 0 : index
    %c0_6 = arith.constant 0 : index
    %13 = vector.load %arg3[%c0_5, %c0_6] : memref<128x768xf32, #tpu.memory_space<vmem>>, vector<128x768xf32>
    %cst_7 = arith.constant dense<0.000000e+00> : vector<8x768xf32>
    %14 = tpu.matmul %12, %13, %cst_7 {dimension_numbers = #tpu.dot_dimension_numbers<[1], [0], [0], [1], [0, 0, 1, 1], [], []>} : vector<8x128xf32>, vector<128x768xf32>, vector<8x768xf32> -> vector<8x768xf32>
    %c0_8 = arith.constant 0 : index
    %c0_9 = arith.constant 0 : index
    %15 = vector.load %arg4[%c0_8, %c0_9] : memref<1x768xf32, #tpu.memory_space<vmem>>, vector<1x768xf32>
    %16 = vector.broadcast %15 : vector<1x768xf32> to vector<8x768xf32>
    %17 = arith.addf %14, %16 : vector<8x768xf32>
    %c0_10 = arith.constant 0 : index
    %c0_11 = arith.constant 0 : index
    %c0_12 = arith.constant 0 : index
    %18 = vector.load %arg10[%c0_10, %c0_11, %c0_12] : memref<2x8x128xf32, #tpu.memory_space<vmem>>, vector<1x8x128xf32>
    %19 = vector.shape_cast %18 : vector<1x8x128xf32> to vector<8x128xf32>
    %c0_13 = arith.constant 0 : index
    %c0_14 = arith.constant 0 : index
    %c0_15 = arith.constant 0 : index
    %20 = vector.load %arg5[%c0_13, %c0_14, %c0_15] : memref<2x128x384xf32, #tpu.memory_space<vmem>>, vector<1x128x384xf32>
    %21 = vector.shape_cast %20 : vector<1x128x384xf32> to vector<128x384xf32>
    %cst_16 = arith.constant dense<0.000000e+00> : vector<8x384xf32>
    %22 = tpu.matmul %19, %21, %cst_16 {dimension_numbers = #tpu.dot_dimension_numbers<[1], [0], [0], [1], [0, 0, 1, 1], [], []>} : vector<8x128xf32>, vector<128x384xf32>, vector<8x384xf32> -> vector<8x384xf32>
    %c0_17 = arith.constant 0 : index
    %c0_18 = arith.constant 0 : index
    %c0_19 = arith.constant 0 : index
    %23 = vector.load %arg6[%c0_17, %c0_18, %c0_19] : memref<2x1x384xf32, #tpu.memory_space<vmem>>, vector<1x1x384xf32>
    %24 = vector.shape_cast %23 : vector<1x1x384xf32> to vector<1x384xf32>
    %25 = vector.broadcast %24 : vector<1x384xf32> to vector<8x384xf32>
    %26 = arith.addf %22, %25 : vector<8x384xf32>
    %27 = vector.extract_strided_slice %17 {offsets = [0, 0], sizes = [8, 128], strides = [1, 1]} : vector<8x768xf32> to vector<8x128xf32>
    %28 = vector.extract_strided_slice %26 {offsets = [0, 0], sizes = [8, 128], strides = [1, 1]} : vector<8x384xf32> to vector<8x128xf32>
    %29 = arith.addf %27, %28 : vector<8x128xf32>
    %30 = arith.negf %29 : vector<8x128xf32>
    %31 = math.exp %30 : vector<8x128xf32>
    %cst_20 = arith.constant 1.000000e+00 : f32
    %32 = vector.broadcast %cst_20 : f32 to vector<8x128xf32>
    %33 = arith.addf %32, %31 : vector<8x128xf32>
    %34 = arith.divf %32, %33 : vector<8x128xf32>
    %35 = vector.extract_strided_slice %17 {offsets = [0, 128], sizes = [8, 128], strides = [1, 1]} : vector<8x768xf32> to vector<8x128xf32>
    %36 = vector.extract_strided_slice %26 {offsets = [0, 128], sizes = [8, 128], strides = [1, 1]} : vector<8x384xf32> to vector<8x128xf32>
    %37 = arith.addf %35, %36 : vector<8x128xf32>
    %38 = arith.negf %37 : vector<8x128xf32>
    %39 = math.exp %38 : vector<8x128xf32>
    %cst_21 = arith.constant 1.000000e+00 : f32
    %40 = vector.broadcast %cst_21 : f32 to vector<8x128xf32>
    %41 = arith.addf %40, %39 : vector<8x128xf32>
    %42 = arith.divf %40, %41 : vector<8x128xf32>
    %43 = vector.extract_strided_slice %17 {offsets = [0, 256], sizes = [8, 128], strides = [1, 1]} : vector<8x768xf32> to vector<8x128xf32>
    %44 = vector.extract_strided_slice %26 {offsets = [0, 256], sizes = [8, 128], strides = [1, 1]} : vector<8x384xf32> to vector<8x128xf32>
    %45 = arith.mulf %34, %44 : vector<8x128xf32>
    %46 = arith.addf %43, %45 : vector<8x128xf32>
    %47 = math.tanh %46 : vector<8x128xf32>
    %cst_22 = arith.constant 1.000000e+00 : f32
    %48 = vector.broadcast %cst_22 : f32 to vector<8x128xf32>
    %49 = arith.subf %48, %42 : vector<8x128xf32>
    %50 = arith.mulf %49, %47 : vector<8x128xf32>
    %51 = arith.mulf %42, %19 : vector<8x128xf32>
    %52 = arith.addf %50, %51 : vector<8x128xf32>
    %c1 = arith.constant 1 : index
    %c0_23 = arith.constant 0 : index
    %c0_24 = arith.constant 0 : index
    %53 = vector.load %arg10[%c1, %c0_23, %c0_24] : memref<2x8x128xf32, #tpu.memory_space<vmem>>, vector<1x8x128xf32>
    %54 = vector.shape_cast %53 : vector<1x8x128xf32> to vector<8x128xf32>
    %c1_25 = arith.constant 1 : index
    %c0_26 = arith.constant 0 : index
    %c0_27 = arith.constant 0 : index
    %55 = vector.load %arg5[%c1_25, %c0_26, %c0_27] : memref<2x128x384xf32, #tpu.memory_space<vmem>>, vector<1x128x384xf32>
    %56 = vector.shape_cast %55 : vector<1x128x384xf32> to vector<128x384xf32>
    %cst_28 = arith.constant dense<0.000000e+00> : vector<8x384xf32>
    %57 = tpu.matmul %54, %56, %cst_28 {dimension_numbers = #tpu.dot_dimension_numbers<[1], [0], [0], [1], [0, 0, 1, 1], [], []>} : vector<8x128xf32>, vector<128x384xf32>, vector<8x384xf32> -> vector<8x384xf32>
    %c1_29 = arith.constant 1 : index
    %c0_30 = arith.constant 0 : index
    %c0_31 = arith.constant 0 : index
    %58 = vector.load %arg6[%c1_29, %c0_30, %c0_31] : memref<2x1x384xf32, #tpu.memory_space<vmem>>, vector<1x1x384xf32>
    %59 = vector.shape_cast %58 : vector<1x1x384xf32> to vector<1x384xf32>
    %60 = vector.broadcast %59 : vector<1x384xf32> to vector<8x384xf32>
    %61 = arith.addf %57, %60 : vector<8x384xf32>
    %62 = vector.extract_strided_slice %17 {offsets = [0, 384], sizes = [8, 128], strides = [1, 1]} : vector<8x768xf32> to vector<8x128xf32>
    %63 = vector.extract_strided_slice %61 {offsets = [0, 0], sizes = [8, 128], strides = [1, 1]} : vector<8x384xf32> to vector<8x128xf32>
    %64 = arith.addf %62, %63 : vector<8x128xf32>
    %65 = arith.negf %64 : vector<8x128xf32>
    %66 = math.exp %65 : vector<8x128xf32>
    %cst_32 = arith.constant 1.000000e+00 : f32
    %67 = vector.broadcast %cst_32 : f32 to vector<8x128xf32>
    %68 = arith.addf %67, %66 : vector<8x128xf32>
    %69 = arith.divf %67, %68 : vector<8x128xf32>
    %70 = vector.extract_strided_slice %17 {offsets = [0, 512], sizes = [8, 128], strides = [1, 1]} : vector<8x768xf32> to vector<8x128xf32>
    %71 = vector.extract_strided_slice %61 {offsets = [0, 128], sizes = [8, 128], strides = [1, 1]} : vector<8x384xf32> to vector<8x128xf32>
    %72 = arith.addf %70, %71 : vector<8x128xf32>
    %73 = arith.negf %72 : vector<8x128xf32>
    %74 = math.exp %73 : vector<8x128xf32>
    %cst_33 = arith.constant 1.000000e+00 : f32
    %75 = vector.broadcast %cst_33 : f32 to vector<8x128xf32>
    %76 = arith.addf %75, %74 : vector<8x128xf32>
    %77 = arith.divf %75, %76 : vector<8x128xf32>
    %78 = vector.extract_strided_slice %17 {offsets = [0, 640], sizes = [8, 128], strides = [1, 1]} : vector<8x768xf32> to vector<8x128xf32>
    %79 = vector.extract_strided_slice %61 {offsets = [0, 256], sizes = [8, 128], strides = [1, 1]} : vector<8x384xf32> to vector<8x128xf32>
    %80 = arith.mulf %69, %79 : vector<8x128xf32>
    %81 = arith.addf %78, %80 : vector<8x128xf32>
    %82 = math.tanh %81 : vector<8x128xf32>
    %cst_34 = arith.constant 1.000000e+00 : f32
    %83 = vector.broadcast %cst_34 : f32 to vector<8x128xf32>
    %84 = arith.subf %83, %77 : vector<8x128xf32>
    %85 = arith.mulf %84, %82 : vector<8x128xf32>
    %86 = arith.mulf %77, %54 : vector<8x128xf32>
    %87 = arith.addf %85, %86 : vector<8x128xf32>
    %c0_35 = arith.constant 0 : index
    %c0_36 = arith.constant 0 : index
    %c0_37 = arith.constant 0 : index
    %88 = vector.load %arg10[%c0_35, %c0_36, %c0_37] : memref<2x8x128xf32, #tpu.memory_space<vmem>>, vector<1x8x128xf32>
    %89 = vector.shape_cast %88 : vector<1x8x128xf32> to vector<8x128xf32>
    %90 = vector.shape_cast %52 : vector<8x128xf32> to vector<1x8x128xf32>
    tpu.vector_store %arg10[%c0_35, %c0_36, %c0_37], %90 {strides = array<i32>} : memref<2x8x128xf32, #tpu.memory_space<vmem>>, vector<1x8x128xf32>,
    %c1_38 = arith.constant 1 : index
    %c0_39 = arith.constant 0 : index
    %c0_40 = arith.constant 0 : index
    %91 = vector.load %arg10[%c1_38, %c0_39, %c0_40] : memref<2x8x128xf32, #tpu.memory_space<vmem>>, vector<1x8x128xf32>
    %92 = vector.shape_cast %91 : vector<1x8x128xf32> to vector<8x128xf32>
    %93 = vector.shape_cast %87 : vector<8x128xf32> to vector<1x8x128xf32>
    tpu.vector_store %arg10[%c1_38, %c0_39, %c0_40], %93 {strides = array<i32>} : memref<2x8x128xf32, #tpu.memory_space<vmem>>, vector<1x8x128xf32>,
    %c0_41 = arith.constant 0 : index
    %c0_42 = arith.constant 0 : index
    %c0_43 = arith.constant 0 : index
    %94 = vector.load %arg7[%c0_41, %c0_42, %c0_43] : memref<2x128x128xf32, #tpu.memory_space<vmem>>, vector<1x128x128xf32>
    %95 = vector.shape_cast %94 : vector<1x128x128xf32> to vector<128x128xf32>
    %cst_44 = arith.constant dense<0.000000e+00> : vector<8x128xf32>
    %96 = tpu.matmul %52, %95, %cst_44 {dimension_numbers = #tpu.dot_dimension_numbers<[1], [0], [0], [1], [0, 0, 1, 1], [], []>} : vector<8x128xf32>, vector<128x128xf32>, vector<8x128xf32> -> vector<8x128xf32>
    %c1_45 = arith.constant 1 : index
    %c0_46 = arith.constant 0 : index
    %c0_47 = arith.constant 0 : index
    %97 = vector.load %arg7[%c1_45, %c0_46, %c0_47] : memref<2x128x128xf32, #tpu.memory_space<vmem>>, vector<1x128x128xf32>
    %98 = vector.shape_cast %97 : vector<1x128x128xf32> to vector<128x128xf32>
    %cst_48 = arith.constant dense<0.000000e+00> : vector<8x128xf32>
    %99 = tpu.matmul %87, %98, %cst_48 {dimension_numbers = #tpu.dot_dimension_numbers<[1], [0], [0], [1], [0, 0, 1, 1], [], []>} : vector<8x128xf32>, vector<128x128xf32>, vector<8x128xf32> -> vector<8x128xf32>
    %100 = arith.addf %96, %99 : vector<8x128xf32>
    %c0_49 = arith.constant 0 : index
    %c0_50 = arith.constant 0 : index
    %101 = vector.load %arg8[%c0_49, %c0_50] : memref<1x128xf32, #tpu.memory_space<vmem>>, vector<1x128xf32>
    %102 = vector.broadcast %101 : vector<1x128xf32> to vector<8x128xf32>
    %103 = arith.addf %100, %102 : vector<8x128xf32>
    %cst_51 = arith.constant dense<0xFF800000> : vector<8xf32>
    %104 = vector.multi_reduction <maximumf>, %103, %cst_51 [1] : vector<8x128xf32> to vector<8xf32>
    %105 = vector.shape_cast %104 : vector<8xf32> to vector<8x1xf32>
    %106 = vector.broadcast %105 : vector<8x1xf32> to vector<8x128xf32>
    %107 = arith.subf %103, %106 : vector<8x128xf32>
    %108 = math.exp %107 : vector<8x128xf32>
    %cst_52 = arith.constant dense<0.000000e+00> : vector<8xf32>
    %109 = vector.multi_reduction <add>, %108, %cst_52 [1] : vector<8x128xf32> to vector<8xf32>
    %110 = vector.shape_cast %109 : vector<8xf32> to vector<8x1xf32>
    %111 = math.log %110 : vector<8x1xf32>
    %112 = vector.broadcast %111 : vector<8x1xf32> to vector<8x128xf32>
    %113 = arith.subf %107, %112 : vector<8x128xf32>
    %c0_53 = arith.constant 0 : index
    %c0_54 = arith.constant 0 : index
    %c0_55 = arith.constant 0 : index
    %114 = vector.load %arg9[%c0_53, %c0_54, %c0_55] : memref<1x8x128xf32, #tpu.memory_space<vmem>>, vector<1x8x128xf32>
    %115 = vector.shape_cast %114 : vector<1x8x128xf32> to vector<8x128xf32>
    %116 = vector.shape_cast %113 : vector<8x128xf32> to vector<1x8x128xf32>
    tpu.vector_store %arg9[%c0_53, %c0_54, %c0_55], %116 {strides = array<i32>} : memref<1x8x128xf32, #tpu.memory_space<vmem>>, vector<1x8x128xf32>,
    %117 = vector.broadcast %105 : vector<8x1xf32> to vector<8x128xf32>
    %118 = arith.cmpf oeq, %103, %117 : vector<8x128xf32>
    %c128_i32 = arith.constant 128 : i32
    %119 = vector.broadcast %c128_i32 : i32 to vector<8x128xi32>
    %120 = arith.select %118, %3, %119 : vector<8x128xi1>, vector<8x128xi32>
    %cst_56 = arith.constant dense<2147483647> : vector<8xi32>
    %121 = vector.multi_reduction <minsi>, %120, %cst_56 [1] : vector<8x128xi32> to vector<8xi32>
    %122 = vector.shape_cast %121 : vector<8xi32> to vector<8x1xi32>
    %c0_57 = arith.constant 0 : index
    %c0_58 = arith.constant 0 : index
    %123 = vector.load %arg11[%c0_57, %c0_58] : memref<8x1xi32, #tpu.memory_space<vmem>>, vector<8x1xi32>
    tpu.vector_store %arg11[%c0_57, %c0_58], %122 {strides = array<i32>} : memref<8x1xi32, #tpu.memory_space<vmem>>, vector<8x1xi32>,
    return
  }
  func.func @transform_0(%arg0: i32) -> (i32, i32, i32) {
    %c0_i32 = arith.constant 0 : i32
    %c0_i32_0 = arith.constant 0 : i32
    %c0_i32_1 = arith.constant 0 : i32
    %c0_i32_2 = arith.constant 0 : i32
    return %c0_i32, %c0_i32_0, %c0_i32_1 : i32, i32, i32
  }
  func.func @transform_1(%arg0: i32) -> (i32, i32) {
    %c0_i32 = arith.constant 0 : i32
    %c0_i32_0 = arith.constant 0 : i32
    %c0_i32_1 = arith.constant 0 : i32
    return %c0_i32, %c0_i32_0 : i32, i32
  }
  func.func @transform_2(%arg0: i32) -> (i32, i32) {
    %c0_i32 = arith.constant 0 : i32
    %c0_i32_0 = arith.constant 0 : i32
    %c0_i32_1 = arith.constant 0 : i32
    return %c0_i32, %c0_i32_0 : i32, i32
  }
  func.func @transform_3(%arg0: i32) -> (i32, i32) {
    %c0_i32 = arith.constant 0 : i32
    %c0_i32_0 = arith.constant 0 : i32
    %c0_i32_1 = arith.constant 0 : i32
    return %c0_i32, %c0_i32_0 : i32, i32
  }
  func.func @transform_4(%arg0: i32) -> (i32, i32, i32) {
    %c0_i32 = arith.constant 0 : i32
    %c0_i32_0 = arith.constant 0 : i32
    %c0_i32_1 = arith.constant 0 : i32
    %c0_i32_2 = arith.constant 0 : i32
    return %c0_i32, %c0_i32_0, %c0_i32_1 : i32, i32, i32
  }
  func.func @transform_5(%arg0: i32) -> (i32, i32, i32) {
    %c0_i32 = arith.constant 0 : i32
    %c0_i32_0 = arith.constant 0 : i32
    %c0_i32_1 = arith.constant 0 : i32
    %c0_i32_2 = arith.constant 0 : i32
    return %c0_i32, %c0_i32_0, %c0_i32_1 : i32, i32, i32
  }
  func.func @transform_6(%arg0: i32) -> (i32, i32, i32) {
    %c0_i32 = arith.constant 0 : i32
    %c0_i32_0 = arith.constant 0 : i32
    %c0_i32_1 = arith.constant 0 : i32
    %c0_i32_2 = arith.constant 0 : i32
    return %c0_i32, %c0_i32_0, %c0_i32_1 : i32, i32, i32
  }
  func.func @transform_7(%arg0: i32) -> (i32, i32) {
    %c0_i32 = arith.constant 0 : i32
    %c0_i32_0 = arith.constant 0 : i32
    %c0_i32_1 = arith.constant 0 : i32
    return %c0_i32, %c0_i32_0 : i32, i32
  }
  func.func @transform_8(%arg0: i32) -> (i32, i32, i32) {
    %c0_i32 = arith.constant 0 : i32
    %c0_i32_0 = arith.constant 0 : i32
    %c0_i32_1 = arith.constant 0 : i32
    return %arg0, %c0_i32, %c0_i32_0 : i32, i32, i32
  }
  func.func @transform_9(%arg0: i32) -> (i32, i32, i32) {
    %c0_i32 = arith.constant 0 : i32
    %c0_i32_0 = arith.constant 0 : i32
    %c0_i32_1 = arith.constant 0 : i32
    %c0_i32_2 = arith.constant 0 : i32
    return %c0_i32, %c0_i32_0, %c0_i32_1 : i32, i32, i32
  }
}

</mosaic_0001>

<bundles_post_ra>
// kernel: tpu_custom_call.1
= control target key start
LH: loop header
LB: loop body
LE: loop exit
PB: predicated region body
PF: predicated region fallthrough
CT: control target
= control target key end

     0   :  { %s3040_s0 = inlined_call_operand.hbm [shape: f32[2,8,128], index: 0, kind: input, shape index: {}]   ;;  %s3041_s1 = inlined_call_operand.hbm [shape: f32[128,128], index: 1, kind: input, shape index: {}]   ;;  %s3042_s2 = inlined_call_operand.hbm [shape: f32[128,768], index: 2, kind: input, shape index: {}]   ;;  %s3043_s3 = inlined_call_operand.vmem [shape: f32[1,768], index: 3, kind: input, shape index: {}]   ;;  %s3044_s4 = inlined_call_operand.hbm [shape: f32[2,128,384], index: 4, kind: input, shape index: {}]   ;;  %s3045_s5 = inlined_call_operand.vmem [shape: f32[2,1,384], index: 5, kind: input, shape index: {}]   ;;  %s3046_s6 = inlined_call_operand.hbm [shape: f32[2,128,128], index: 6, kind: input, shape index: {}]   ;;  %s3047_s7 = inlined_call_operand.vmem [shape: f32[1,128], index: 7, kind: input, shape index: {}]   ;;  %s3048_s8 = inlined_call_operand.hbm [shape: f32[8,8,128], index: 8, kind: output, shape index: {0}]   ;;  %s3049_s9 = inlined_call_operand.hbm [shape: f32[2,8,128], index: 9, kind: output, shape index: {1}]  }
   0x1   :  { %3062 = sst [smem:[#allocation24_spill]] %s3040_s0 }
   0x2   :  { %3063 = sst [smem:[#allocation25_spill]] %s3041_s1 }
   0x3   :  { %3064 = sst [smem:[#allocation26_spill]] %s3044_s4 }
   0x4   :  { %15 = vsyncpa [#allocation4], 0 }
   0x5   :  { %16 = vsyncpa [#allocation7], 0 }
   0x6   :  { %17 = vsyncpa [#allocation10], 0 }
   0x7   :  { %18 = vsyncpa [#allocation5], 0 }
   0x8   :  { %20 = vsyncpa [#allocation5 + $0x1], 0 }
   0x9   :  { %21 = vsyncpa [#allocation14], 0  ;;  %s2664_s30 = smov 0   ;;  %s2666_s10 = smov 0  }
   0xa   :  { %s2668_s11 = smov 0   ;;  %s2670_s12 = smov 0  }
   0xb LB: > { %3065 = sst [smem:[#allocation20_spill]] %s2587_s11  ;;  %s2685_s13 = sadd.s32 4294967295, %s2591_s12   ;;  %s2591_s12 = sphi %s2670_s12, %s3095_s12   ;;  %s2587_s11 = sphi %s2668_s11, %s3097_s11   ;;  %s2583_s10 = sphi %s2666_s10, %s3099_s10   ;;  %s2579_s30 = sphi %s2664_s30, %s3098_s30  }
   0xc   : > { %s1636_s14 = sadd.s32 4294967294, %s2591_s12   ;;  %s2689_s15 = sadd.s32 1, %s2591_s12  }
   0xd   : > { %3066 = sst [smem:[#allocation21_spill]] %s2689_s15  ;;  %s202_s16 = sadd.s32 1, %s2587_s11 }
   0xe   : > { %s199_s17 = ssub.s32 %s2591_s12, %s2689_s15  ;;  %p212_p0 = scmp.ne.s32.totalorder %s2587_s11, %s2583_s10 }
   0xf   : > { %p200_p1 = scmp.eq.s32.totalorder %s199_s17, 0  ;;  %p3050_p2 = scmp.eq.s32.totalorder %s2685_s13, 7 }
  0x10   : > { %p218_p3 = scmp.ne.s32.totalorder %s2583_s10, %s2579_s30  ;;  %p219_p4 = scmp.eq.s32.totalorder %s1636_s14, 7 }
  0x11   : > { %s2700_s18 = scalar_select %p200_p1, %s2587_s11, %s202_s16  }
  0x12   : > { %p2704_p5 = por %p3050_p2, %p212_p0  ;;  %p2708_p6 = por %p219_p4, %p218_p3 }
  0x13   : > { %3067 = sst [smem:[#allocation22_spill]] %s2700_s18  ;;  %p1637_p7 = scmp.ge.s32.totalorder %s2591_s12, 1 }
  0x14   : > { %s3068_s19 = scalar_select %p2704_p5, 1, 0 }
  0x15   : > { %s3069_s20 = scalar_select %p2708_p6, 1, 0 }
  0x16   : > { %p247_p8 = scmp.lt.s32.totalorder %s2591_s12, 9  ;;  %p3051_p10 = scmp.eq.s32.totalorder %s2685_s13, 0 }
  0x17   : > { %3070 = sst [smem:[#allocation23_spill]] %s3069_s20  ;;  %s2593_s22 = smov [#allocation6]  }
  0x18   : > { %p2716_p11 = pnand %p1637_p7, %p247_p8  ;;  %s272_s23 = sshll.u32 %s2593_s22, 4  ;;  %s273_s23 = int_to_ptr.vmem [resolvable:$true] %s272_s23 }
  0x19   : > { %s2594_s25 = smov [#allocation9]   ;;  %s3073_s1 = sld [smem:[#allocation25_spill]] }
  0x1a   : > { %s3071_s21 = scalar_select %p2716_p11, 1, 0 }
  0x1b   : > { %p2237_p12 = pneg %p2716_p11  ;;  %s301_s26 = sshll.u32 %s2594_s25, 4  ;;  %s2728_s26 = int_to_ptr.vmem [resolvable:$true] %s301_s26 }
  0x1d   : > { %p2724_p13 = pnand %p3051_p10, %p2237_p12 }
  0x1f   : > { %s2347_s29 = scalar_lea.hbm %s3073_s1, 2048  ;;  %p2738_p1 = pneg %p2724_p13 }
  0x20   : > { %p2348_p0 = scmp.ne.s32.totalorder %s3073_s1, %s2347_s29  ;;  %p2354_p7 = scmp.lt.u32.totalorder %s2347_s29, %s3073_s1 }
  0x22   : > { %p2350_p3 = pnand %p2738_p1, %p2348_p0 }
  0x24   : > { %p2351_p4 = pneg %p2350_p3 }
  0x26   : > { %p2356_p8 = pnand %p2354_p7, %p2351_p4 }
  0x28   : > { %2359 = shalt.err (!%p2356_p8)
}
  0x29   : > { %s2360_s27 = scalar_lea.vmem %s273_s23, 2048  ;;  %p2368_p10 = scmp.lt.s32.totalorder %s273_s23, %s273_s23 }
  0x2a   : > { %p2361_p12 = scmp.ne.s32.totalorder %s273_s23, %s2360_s27  ;;  %p2369_p6 = scmp.lt.s32.totalorder %s2360_s27, %s2360_s27 }
  0x2c   : > { %p2363_p2 = pnand %p2361_p12, %p2738_p1  ;;  %p2370_p5 = por %p2369_p6, %p2368_p10 }
  0x2e   : > { %p2364_p9 = pneg %p2363_p2 }
  0x30   : > { %p2371_p11 = pnand %p2370_p5, %p2364_p9 }
  0x32   : > { %2374 = shalt.err (!%p2371_p11)
}
  0x33   : > { %s3058_s28 = smov 128   ;;  %s3060_s14 = smov 8  }
  0x34   : > { %2243 = dma.hbm_to_vmem [thread:$0]  (!%p2724_p13), %s3073_s1, 2048, %s273_s23, [#allocation7], %s3058_s28, %s3058_s28, %s3060_s14  }
  0x35   : > { %s3075_s4 = sld [smem:[#allocation26_spill]] }
  0x3b   : > { %s2375_s18 = scalar_lea.hbm %s3075_s4, 12288 }
  0x3c   : > { %p2376_p2 = scmp.ne.s32.totalorder %s3075_s4, %s2375_s18  ;;  %p2382_p9 = scmp.lt.u32.totalorder %s2375_s18, %s3075_s4 }
  0x3e   : > { %p2378_p5 = pnand %p2376_p2, %p2738_p1 }
  0x40   : > { %p2379_p6 = pneg %p2378_p5 }
  0x42   : > { %p2384_p10 = pnand %p2382_p9, %p2379_p6 }
  0x44   : > { %2387 = shalt.err (!%p2384_p10)
}
  0x45   : > { %s2388_s23 = scalar_lea.vmem %s2728_s26, 12288  ;;  %p2396_p4 = scmp.lt.s32.totalorder %s2728_s26, %s2728_s26 }
  0x46   : > { %p2389_p11 = scmp.ne.s32.totalorder %s2728_s26, %s2388_s23  ;;  %p2397_p7 = scmp.lt.s32.totalorder %s2388_s23, %s2388_s23 }
  0x48   : > { %p2391_p0 = pnand %p2389_p11, %p2738_p1  ;;  %p2398_p8 = por %p2397_p7, %p2396_p4 }
  0x4a   : > { %p2392_p3 = pneg %p2391_p0 }
  0x4c   : > { %p2399_p12 = pnand %p2398_p8, %p2392_p3 }
  0x4e   : > { %2402 = shalt.err (!%p2399_p12)
}
  0x4f   : > { %s2597_s11 = smov 384   ;;  %s2598_s15 = smov 24  }
  0x50   : > { %2249 = dma.hbm_to_vmem [thread:$0]  (!%p2724_p13), %s3075_s4, 12288, %s2728_s26, [#allocation10], %s2597_s11, %s2597_s11, %s2598_s15  }
  0x51   : > { %s2599_s29 = smov [#allocation3]   ;;  %s2600_s22 = smov [#allocation8]  }
  0x52   : > { %s259_s16 = sshll.u32 %s2599_s29, 4  ;;  %s285_s25 = sshll.u32 %s2600_s22, 4  ;;  %s260_s16 = int_to_ptr.vmem [resolvable:$true] %s259_s16  ;;  %s2780_s25 = int_to_ptr.vmem [resolvable:$true] %s285_s25 }
  0x53   : > { %s3076_s0 = sld [smem:[#allocation24_spill]] }
  0x59   : > { %s2403_s28 = scalar_lea.hbm %s3076_s0, 256 }
  0x5a   : > { %p2404_p2 = scmp.ne.s32.totalorder %s3076_s0, %s2403_s28  ;;  %p2410_p9 = scmp.lt.u32.totalorder %s2403_s28, %s3076_s0 }
  0x5c   : > { %p2406_p5 = pnand %p2404_p2, %p2738_p1 }
  0x5e   : > { %p2407_p6 = pneg %p2406_p5 }
  0x60   : > { %p2412_p10 = pnand %p2410_p9, %p2407_p6 }
  0x62   : > { %2415 = shalt.err (!%p2412_p10)
}
  0x63   : > { %s2416_s11 = scalar_lea.vmem %s260_s16, 256  ;;  %p2424_p4 = scmp.lt.s32.totalorder %s260_s16, %s260_s16 }
  0x64   : > { %p2417_p11 = scmp.ne.s32.totalorder %s260_s16, %s2416_s11  ;;  %p2425_p7 = scmp.lt.s32.totalorder %s2416_s11, %s2416_s11 }
  0x66   : > { %p2419_p0 = pnand %p2417_p11, %p2738_p1  ;;  %p2426_p8 = por %p2425_p7, %p2424_p4 }
  0x68   : > { %p2420_p3 = pneg %p2419_p0 }
  0x6a   : > { %p2427_p12 = pnand %p2426_p8, %p2420_p3 }
  0x6c   : > { %2430 = shalt.err (!%p2427_p12)
}
  0x6d   : > { %s3077_s1 = smov 8   ;;  %s3078_s14 = smov 128  }
  0x6e   : > { %2240 = dma.hbm_to_vmem [thread:$0]  (!%p2724_p13), %s3076_s0, 256, %s260_s16, [#allocation4], %s3078_s14, %s3078_s14, %s3077_s1  }
  0x6f   : > { %s2431_s22 = scalar_lea.hbm %s3042_s2, 12288 }
  0x70   : > { %p2432_p2 = scmp.ne.s32.totalorder %s3042_s2, %s2431_s22  ;;  %p2438_p9 = scmp.lt.u32.totalorder %s2431_s22, %s3042_s2 }
  0x72   : > { %p2434_p5 = pnand %p2432_p2, %p2738_p1 }
  0x74   : > { %p2435_p6 = pneg %p2434_p5 }
  0x76   : > { %p2440_p10 = pnand %p2438_p9, %p2435_p6 }
  0x78   : > { %2443 = shalt.err (!%p2440_p10)
}
  0x79   : > { %s2444_s16 = scalar_lea.vmem %s2780_s25, 12288  ;;  %p2452_p4 = scmp.lt.s32.totalorder %s2780_s25, %s2780_s25 }
  0x7a   : > { %p2445_p11 = scmp.ne.s32.totalorder %s2780_s25, %s2444_s16  ;;  %p2453_p7 = scmp.lt.s32.totalorder %s2444_s16, %s2444_s16 }
  0x7c   : > { %p2447_p0 = pnand %p2445_p11, %p2738_p1  ;;  %p2454_p8 = por %p2453_p7, %p2452_p4 }
  0x7e   : > { %p2448_p3 = pneg %p2447_p0 }
  0x80   : > { %p2455_p12 = pnand %p2454_p8, %p2448_p3 }
  0x82   : > { %2458 = shalt.err (!%p2455_p12)
}
  0x83   : > { %s2601_s11 = smov 768   ;;  %s2602_s15 = smov 48  }
  0x84   : > { %2246 = dma.hbm_to_vmem [thread:$0]  (!%p2724_p13), %s3042_s2, 12288, %s2780_s25, [#allocation7], %s2601_s11, %s2601_s11, %s2602_s15  }
  0x85   : > { %s2603_s29 = smov [#allocation11]   ;;  %s2459_s18 = scalar_lea.hbm %s3046_s6, 4096 }
  0x86   : > { %s317_s22 = sshll.u32 %s2603_s29, 4  ;;  %p2460_p2 = scmp.ne.s32.totalorder %s3046_s6, %s2459_s18  ;;  %s318_s22 = int_to_ptr.vmem [resolvable:$true] %s317_s22 }
  0x87   : > { %p2466_p9 = scmp.lt.u32.totalorder %s2459_s18, %s3046_s6 }
  0x88   : > { %p2462_p5 = pnand %p2460_p2, %p2738_p1 }
  0x8a   : > { %p2463_p6 = pneg %p2462_p5 }
  0x8c   : > { %p2468_p10 = pnand %p2466_p9, %p2463_p6 }
  0x8e   : > { %2471 = shalt.err (!%p2468_p10)
}
  0x8f   : > { %s2472_s25 = scalar_lea.vmem %s318_s22, 4096  ;;  %p2480_p4 = scmp.lt.s32.totalorder %s318_s22, %s318_s22 }
  0x90   : > { %p2473_p11 = scmp.ne.s32.totalorder %s318_s22, %s2472_s25  ;;  %p2481_p7 = scmp.lt.s32.totalorder %s2472_s25, %s2472_s25 }
  0x92   : > { %p2475_p0 = pnand %p2473_p11, %p2738_p1  ;;  %p2482_p8 = por %p2481_p7, %p2480_p4 }
  0x94   : > { %p2476_p3 = pneg %p2475_p0 }
  0x96   : > { %p2483_p12 = pnand %p2482_p8, %p2476_p3 }
  0x98   : > { %2486 = shalt.err (!%p2483_p12)
}
  0x99   : > { %2252 = dma.hbm_to_vmem [thread:$0]  (!%p2724_p13), %s3046_s6, 4096, %s318_s22, [#allocation10], %s3078_s14, %s3078_s14, %s3077_s1  }
  0x9a   : > { %p3079_p2 = scmp.ne.s32.totalorder %s3071_s21, 0 }
  0x9b   : > { %p3080_p1 = scmp.eq.s32.totalorder (!%p3079_p2), %s2685_s13, 0 }
  0x9c   : > { %336 = sbr.rel (%p3079_p2) target bundleno = 1511 (0x5e7), region = 52 }
  0xa3   : > { %2558 = dma.done.wait (%p3080_p1), [#allocation4], 256   ;;  %p3081_p5 = pmov %p3080_p1 }
  0xa4   : > { %p3082_p6 = pmov %p3080_p1 }
  0xa5   : > { %2560 = vsyncadd (%p3081_p5), [#allocation4], 4294967040 }
  0xa6   : > { %2562 = dma.done.wait (%p3082_p6), [#allocation7], 14336   ;;  %p3083_p9 = pmov %p3080_p1 }
  0xa7   : > { %p3084_p10 = pmov %p3080_p1 }
  0xa8   : > { %2564 = vsyncadd (%p3083_p9), [#allocation7], 4294952960 }
  0xa9   : > { %2566 = dma.done.wait (%p3084_p10), [#allocation10], 16384   ;;  %p3085_p13 = pmov %p3080_p1 }
  0xaa   : > { %s378_s21 = sand.u32 1, %s2583_s10   ;;  %p3086_p11 = scmp.ne.s32.totalorder %s2685_s13, 0 }
  0xab   : > { %2568 = vsyncadd (%p3085_p13), [#allocation10], 4294950912  ;;  %s2864_s24 = sshll.u32 %s378_s21, 3  ;;  %v387_v0 = vld [vmem:[#allocation3] sm:$0xff] (!%p3086_p11)  ;;  %v388_v1 = vld [vmem:[#allocation3 + $0x8] sm:$0xff] (!%p3086_p11)  ;;  %vm391_vm0 = vcmask (!%p3086_p11), 7168  }
  0xac   : > { %s380_s17 = scalar_lea.vmem [#allocation12], %s2864_s24  ;;  %386 = sbr.rel (%p3086_p11) target bundleno = 179 (0xb3), region = 76  ;;  %389 = vst [vmem:[#allocation13] sm:$0xff] (!%p3086_p11), %v387_v0  ;;  %390 = vst [vmem:[#allocation13 + $0x8] sm:$0xff] (!%p3086_p11), %v388_v1  ;;  %v2604_v2 = vmov (!%p3086_p11), 1  }
  0xad   : > { %392 = vst.msk [vmem:[#allocation2] sm:$0xff] (!%p3086_p11), %vm391_vm0, %v2604_v2 }
  0xb3 PF: > { %v402_v4 = vld [vmem:[#allocation6] sm:$0xff]  ;;  %v403_v5 = vld [vmem:[#allocation6 + $0x8] sm:$0xff]  ;;  %v2605_v6 = vmov 0   ;;  %v2606_v7 = vmov 0.0|0.0   ;;  %v404_v9 = vld [vmem:[#allocation6 + $0x10] sm:$0xff]  ;;  %vm2607_vm1 = vmmov 0  }
  0xb4   : > { %v395_v3 = vld [vmem:[#allocation2] sm:$0xff]  ;;  %2322 = vset.pattern.permute.xlu0 %v2605_v6  ;;  %1925 = vmatprep.subr.bf16.mxu0 %v2606_v7  ;;  %v1926_v8 = vpack.c.bf16 %v403_v5, %v402_v4  ;;  %v405_v10 = vld [vmem:[#allocation6 + $0x18] sm:$0xff]  ;;  %v2608_v11 = vmov 0.0   ;;  %v406_v13 = vld [vmem:[#allocation6 + $0x20] sm:$0xff]  ;;  %s1660_s27 = sshll.u32 %s2685_s13, 7  ;;  %s1515_s23 = sshll.u32 %s380_s17, 4  ;;  %s2973_s23 = int_to_ptr.vmem [resolvable:$true] %s1515_s23 }
  0xb5   : > { %397 = vperm.xlu0 %2322, %v395_v3   ;;  %1782 = vmatprep.mubr.msk.f32.mxu0 %vm2607_vm1, %v2608_v11  ;;  %v1929_v12 = vpack.c.bf16 %v405_v10, %v404_v9  ;;  %v407_v14 = vld [vmem:[#allocation6 + $0x28] sm:$0xff]  ;;  %v496_v16 = vld [vmem:[#allocation8 + $0x38] sm:$0xff]  ;;  %v408_v18 = vld [vmem:[#allocation6 + $0x30] sm:$0xff]  ;;  %s2971_s16 = scalar_lea.hbm %s3048_s8, %s1660_s27  ;;  %s2610_s25 = smov [#allocation13]  }
  0xb6   : > { %1927 = vmatpush3.bf16.msra.mxu0 %v1926_v8  ;;  %681 = vmatprep.mubr.f32.mxu1 %v2608_v11  ;;  %v490_v15 = vld [vmem:[#allocation8 + $0x8] sm:$0xff]  ;;  %v1932_v17 = vpack.c.bf16 %v407_v14, %v406_v13  ;;  %v489_v20 = vld [vmem:[#allocation8] sm:$0xff]  ;;  %v495_v21 = vld [vmem:[#allocation8 + $0x30] sm:$0xff]  ;;  %s1525_s0 = sshll.u32 %s2610_s25, 4  ;;  %p3087_p3 = scmp.eq.s32.totalorder %s2685_s13, 7  ;;  %s1526_s0 = int_to_ptr.vmem [resolvable:$true] %s1525_s0 }
  0xb7   : > { %1928 = vmatprep.subr.bf16.mxu0 %v2606_v7  ;;  %v1949_v19 = vpack.c.bf16 %v496_v16, %v490_v15  ;;  %v409_v22 = vld [vmem:[#allocation6 + $0x38] sm:$0xff]  ;;  %v1951_v23 = vpack.c.bf16 %v495_v21, %v489_v20  ;;  %v502_v24 = vld [vmem:[#allocation8 + $0x68] sm:$0xff]  ;;  %v501_v27 = vld [vmem:[#allocation8 + $0x60] sm:$0xff]  ;;  %v393_v20 = vlaneseq  ;;  %s2487_s4 = scalar_lea.vmem %s1526_s0, 256  ;;  %p2494_p8 = scmp.lt.s32.totalorder %s1526_s0, %s1526_s0 }
  0xb8   : > { %v508_v25 = vld [vmem:[#allocation8 + $0x98] sm:$0xff]  ;;  %v507_v28 = vld [vmem:[#allocation8 + $0x90] sm:$0xff]  ;;  %v1935_v29 = vpack.c.bf16 %v409_v22, %v408_v18  ;;  %v410_v30 = vld [vmem:[#allocation6 + $0x40] sm:$0xff]  ;;  %p2488_p0 = scmp.ne.s32.totalorder %s1526_s0, %s2487_s4  ;;  %p2495_p12 = scmp.lt.s32.totalorder %s2487_s4, %s2487_s4 }
  0xb9   : > { %1950 = vmatprep.subr.bf16.mxu1 %v1949_v19  ;;  %v1953_v26 = vpack.c.bf16 %v508_v25, %v502_v24  ;;  %v1955_v31 = vpack.c.bf16 %v507_v28, %v501_v27  ;;  %v514_v32 = vld [vmem:[#allocation8 + $0xc8] sm:$0xff]  ;;  %v520_v33 = vld [vmem:[#allocation8 + $0xf8] sm:$0xff]  ;;  %v513_v36 = vld [vmem:[#allocation8 + $0xc0] sm:$0xff] }
  0xba   : > { %1930 = vmatpush3.bf16.msra.mxu0 %v1929_v12  ;;  %1952 = vmatpush1.bf16.msra.mxu1 %v1951_v23  ;;  %v411_v34 = vld [vmem:[#allocation6 + $0x48] sm:$0xff]  ;;  %v1957_v35 = vpack.c.bf16 %v520_v33, %v514_v32  ;;  %v519_v37 = vld [vmem:[#allocation8 + $0xf0] sm:$0xff]  ;;  %v532_v40 = vld [vmem:[#allocation8 + $0x158] sm:$0xff]  ;;  %v2881_v23 = vand.u32 127, %v393_v20  ;;  %v2609_v33 = vmov 1.0   ;;  %p2489_p4 = pnand %p2488_p0, %p3087_p3  ;;  %p2496_p2 = por %p2495_p12, %p2494_p8 }
  0xbb   : > { %1931 = vmatprep.subr.bf16.mxu0 %v2606_v7  ;;  %1954 = vmatprep.subr.bf16.mxu1 %v1953_v26  ;;  %v526_v38 = vld [vmem:[#allocation8 + $0x128] sm:$0xff]  ;;  %v1959_v39 = vpack.c.bf16 %v519_v37, %v513_v36  ;;  %v1938_v41 = vpack.c.bf16 %v411_v34, %v410_v30  ;;  %v412_v42 = vld [vmem:[#allocation6 + $0x50] sm:$0xff]  ;;  %v525_v44 = vld [vmem:[#allocation8 + $0x120] sm:$0xff] }
  0xbc   : > { %v1961_v43 = vpack.c.bf16 %v532_v40, %v526_v38  ;;  %v531_v45 = vld [vmem:[#allocation8 + $0x150] sm:$0xff]  ;;  %v413_v46 = vld [vmem:[#allocation6 + $0x58] sm:$0xff]  ;;  %v538_v47 = vld [vmem:[#allocation8 + $0x188] sm:$0xff]  ;;  %p2490_p7 = pneg %p2489_p4 }
  0xbd   : > { %v544_v48 = vld [vmem:[#allocation8 + $0x1b8] sm:$0xff]  ;;  %v1963_v49 = vpack.c.bf16 %v531_v45, %v525_v44  ;;  %v1941_v50 = vpack.c.bf16 %v413_v46, %v412_v42  ;;  %v414_v51 = vld [vmem:[#allocation6 + $0x60] sm:$0xff]  ;;  %v543_v54 = vld [vmem:[#allocation8 + $0x1b0] sm:$0xff] }
  0xbe   : > { %1933 = vmatpush3.bf16.msra.mxu0 %v1932_v17  ;;  %1956 = vmatpush1.bf16.msra.mxu1 %v1955_v31  ;;  %v1965_v52 = vpack.c.bf16 %v544_v48, %v538_v47  ;;  %v537_v53 = vld [vmem:[#allocation8 + $0x180] sm:$0xff]  ;;  %v415_v55 = vld [vmem:[#allocation6 + $0x68] sm:$0xff]  ;;  %v556_v57 = vld [vmem:[#allocation8 + $0x218] sm:$0xff]  ;;  %p2497_p1 = pnand %p2496_p2, %p2490_p7 }
  0xbf   : > { %1934 = vmatprep.subr.bf16.mxu0 %v2606_v7  ;;  %1958 = vmatprep.subr.bf16.mxu1 %v1957_v35  ;;  %v550_v56 = vld [vmem:[#allocation8 + $0x1e8] sm:$0xff]  ;;  %v1967_v58 = vpack.c.bf16 %v543_v54, %v537_v53  ;;  %v1944_v59 = vpack.c.bf16 %v415_v55, %v414_v51  ;;  %v416_v60 = vld [vmem:[#allocation6 + $0x70] sm:$0xff]  ;;  %v549_v62 = vld [vmem:[#allocation8 + $0x1e0] sm:$0xff] }
  0xc0   : > { %v1969_v61 = vpack.c.bf16 %v556_v57, %v550_v56  ;;  %v555_v63 = vld [vmem:[#allocation8 + $0x210] sm:$0xff]  ;;  %v417_v0 = vld [vmem:[#allocation6 + $0x78] sm:$0xff]  ;;  %v562_v1 = vld [vmem:[#allocation8 + $0x248] sm:$0xff] }
  0xc1   : > { %v568_v2 = vld [vmem:[#allocation8 + $0x278] sm:$0xff]  ;;  %v498_v4 = vld [vmem:[#allocation8 + $0x48] sm:$0xff]  ;;  %v1971_v5 = vpack.c.bf16 %v555_v63, %v549_v62  ;;  %v1947_v6 = vpack.c.bf16 %v417_v0, %v416_v60  ;;  %v561_v9 = vld [vmem:[#allocation8 + $0x240] sm:$0xff] }
  0xc2   : > { %1936 = vmatpush3.bf16.msra.mxu0 %v1935_v29  ;;  %1960 = vmatpush1.bf16.msra.mxu1 %v1959_v39  ;;  %v492_v3 = vld [vmem:[#allocation8 + $0x18] sm:$0xff]  ;;  %v1973_v8 = vpack.c.bf16 %v568_v2, %v562_v1  ;;  %v567_v10 = vld [vmem:[#allocation8 + $0x270] sm:$0xff]  ;;  %v574_v13 = vld [vmem:[#allocation8 + $0x2a8] sm:$0xff] }
  0xc3   : > { %1937 = vmatprep.subr.bf16.mxu0 %v2606_v7  ;;  %1962 = vmatprep.subr.bf16.mxu1 %v1961_v43  ;;  %v1981_v12 = vpack.c.bf16 %v498_v4, %v492_v3  ;;  %v580_v14 = vld [vmem:[#allocation8 + $0x2d8] sm:$0xff]  ;;  %v1975_v15 = vpack.c.bf16 %v567_v10, %v561_v9  ;;  %v573_v17 = vld [vmem:[#allocation8 + $0x2a0] sm:$0xff]  ;;  %v579_v18 = vld [vmem:[#allocation8 + $0x2d0] sm:$0xff] }
  0xc4   : > { %v1977_v16 = vpack.c.bf16 %v580_v14, %v574_v13  ;;  %v1979_v19 = vpack.c.bf16 %v579_v18, %v573_v17  ;;  %v491_v21 = vld [vmem:[#allocation8 + $0x10] sm:$0xff]  ;;  %v497_v22 = vld [vmem:[#allocation8 + $0x40] sm:$0xff]  ;;  %v504_v24 = vld [vmem:[#allocation8 + $0x78] sm:$0xff] }
  0xc5   : > { %v510_v25 = vld [vmem:[#allocation8 + $0xa8] sm:$0xff]  ;;  %v1983_v26 = vpack.c.bf16 %v497_v22, %v491_v21  ;;  %v503_v29 = vld [vmem:[#allocation8 + $0x70] sm:$0xff]  ;;  %v509_v30 = vld [vmem:[#allocation8 + $0xa0] sm:$0xff] }
  0xc6   : > { %1939 = vmatpush3.bf16.msra.mxu0 %v1938_v41  ;;  %1964 = vmatpush1.bf16.msra.mxu1 %v1963_v49  ;;  %v1985_v28 = vpack.c.bf16 %v510_v25, %v504_v24  ;;  %v516_v31 = vld [vmem:[#allocation8 + $0xd8] sm:$0xff]  ;;  %v522_v32 = vld [vmem:[#allocation8 + $0x108] sm:$0xff]  ;;  %v1987_v34 = vpack.c.bf16 %v509_v30, %v503_v29  ;;  %v515_v36 = vld [vmem:[#allocation8 + $0xd0] sm:$0xff] }
  0xc7   : > { %1940 = vmatprep.subr.bf16.mxu0 %v2606_v7  ;;  %1966 = vmatprep.subr.bf16.mxu1 %v1965_v52  ;;  %v1989_v35 = vpack.c.bf16 %v522_v32, %v516_v31  ;;  %v521_v37 = vld [vmem:[#allocation8 + $0x100] sm:$0xff]  ;;  %v528_v38 = vld [vmem:[#allocation8 + $0x138] sm:$0xff]  ;;  %v534_v39 = vld [vmem:[#allocation8 + $0x168] sm:$0xff] }
  0xc8   : > { %v1991_v40 = vpack.c.bf16 %v521_v37, %v515_v36  ;;  %v1993_v41 = vpack.c.bf16 %v534_v39, %v528_v38  ;;  %v527_v42 = vld [vmem:[#allocation8 + $0x130] sm:$0xff]  ;;  %v533_v43 = vld [vmem:[#allocation8 + $0x160] sm:$0xff]  ;;  %v540_v44 = vld [vmem:[#allocation8 + $0x198] sm:$0xff] }
  0xc9   : > { %v546_v45 = vld [vmem:[#allocation8 + $0x1c8] sm:$0xff]  ;;  %v1995_v46 = vpack.c.bf16 %v533_v43, %v527_v42  ;;  %v539_v48 = vld [vmem:[#allocation8 + $0x190] sm:$0xff]  ;;  %v545_v49 = vld [vmem:[#allocation8 + $0x1c0] sm:$0xff] }
  0xca   : > { %1942 = vmatpush3.bf16.msra.mxu0 %v1941_v50  ;;  %1968 = vmatpush1.bf16.msra.mxu1 %v1967_v58  ;;  %v1997_v47 = vpack.c.bf16 %v546_v45, %v540_v44  ;;  %v552_v50 = vld [vmem:[#allocation8 + $0x1f8] sm:$0xff]  ;;  %v558_v51 = vld [vmem:[#allocation8 + $0x228] sm:$0xff]  ;;  %v1999_v52 = vpack.c.bf16 %v545_v49, %v539_v48  ;;  %v551_v54 = vld [vmem:[#allocation8 + $0x1f0] sm:$0xff] }
  0xcb   : > { %1943 = vmatprep.subr.bf16.mxu0 %v2606_v7  ;;  %1970 = vmatprep.subr.bf16.mxu1 %v1969_v61  ;;  %v2001_v53 = vpack.c.bf16 %v558_v51, %v552_v50  ;;  %v557_v55 = vld [vmem:[#allocation8 + $0x220] sm:$0xff]  ;;  %v564_v56 = vld [vmem:[#allocation8 + $0x258] sm:$0xff]  ;;  %v570_v57 = vld [vmem:[#allocation8 + $0x288] sm:$0xff] }
  0xcc   : > { %v2003_v58 = vpack.c.bf16 %v557_v55, %v551_v54  ;;  %v563_v60 = vld [vmem:[#allocation8 + $0x250] sm:$0xff]  ;;  %v569_v61 = vld [vmem:[#allocation8 + $0x280] sm:$0xff]  ;;  %v576_v62 = vld [vmem:[#allocation8 + $0x2b8] sm:$0xff] }
  0xcd   : > { %v582_v63 = vld [vmem:[#allocation8 + $0x2e8] sm:$0xff]  ;;  %v2007_v0 = vpack.c.bf16 %v569_v61, %v563_v60  ;;  %v575_v2 = vld [vmem:[#allocation8 + $0x2b0] sm:$0xff]  ;;  %v581_v3 = vld [vmem:[#allocation8 + $0x2e0] sm:$0xff] }
  0xce   : > { %1945 = vmatpush3.bf16.msra.mxu0 %v1944_v59  ;;  %1972 = vmatpush1.bf16.msra.mxu1 %v1971_v5  ;;  %v2005_v59 = vpack.c.bf16 %v570_v57, %v564_v56  ;;  %v2009_v1 = vpack.c.bf16 %v582_v63, %v576_v62  ;;  %v2011_v4 = vpack.c.bf16 %v581_v3, %v575_v2  ;;  %v494_v5 = vld [vmem:[#allocation8 + $0x28] sm:$0xff]  ;;  %v493_v9 = vld [vmem:[#allocation8 + $0x20] sm:$0xff]  ;;  %v499_v10 = vld [vmem:[#allocation8 + $0x50] sm:$0xff] }
  0xcf   : > { %1946 = vmatprep.subr.bf16.mxu0 %v2606_v7  ;;  %1974 = vmatprep.subr.bf16.mxu1 %v1973_v8  ;;  %v836_v13 = vld [vmem:[#allocation9 + $0x28] sm:$0xff]  ;;  %v2015_v17 = vpack.c.bf16 %v499_v10, %v493_v9  ;;  %v511_v25 = vld [vmem:[#allocation8 + $0xb0] sm:$0xff]  ;;  %v524_v29 = vld [vmem:[#allocation8 + $0x118] sm:$0xff] }
  0xd0   : > { %v506_v14 = vld [vmem:[#allocation8 + $0x88] sm:$0xff]  ;;  %v517_v32 = vld [vmem:[#allocation8 + $0xe0] sm:$0xff]  ;;  %v536_v38 = vld [vmem:[#allocation8 + $0x178] sm:$0xff] }
  0xd1   : > { %v848_v36 = vld [vmem:[#allocation9 + $0x88] sm:$0xff]  ;;  %v535_v43 = vld [vmem:[#allocation8 + $0x170] sm:$0xff]  ;;  %v851_v44 = vld [vmem:[#allocation9 + $0xa0] sm:$0xff] }
  0xd2   : > { %1948 = vmatpush3.bf16.msra.mxu0 %v1947_v6  ;;  %1976 = vmatpush1.bf16.msra.mxu1 %v1975_v15  ;;  %v500_v6 = vld [vmem:[#allocation8 + $0x58] sm:$0xff]  ;;  %v530_v37 = vld [vmem:[#allocation8 + $0x148] sm:$0xff]  ;;  %v541_v50 = vld [vmem:[#allocation8 + $0x1a0] sm:$0xff] }
  0xd3   : > { %1982 = vmatprep.subr.bf16.mxu0 %v1981_v12  ;;  %1978 = vmatprep.subr.bf16.mxu1 %v1977_v16  ;;  %v2013_v8 = vpack.c.bf16 %v500_v6, %v494_v5  ;;  %v833_v12 = vld [vmem:[#allocation9 + $0x10] sm:$0xff]  ;;  %v512_v15 = vld [vmem:[#allocation8 + $0xb8] sm:$0xff]  ;;  %v2025_v42 = vpack.c.bf16 %v536_v38, %v530_v37  ;;  %v860_v54 = vld [vmem:[#allocation9 + $0xe8] sm:$0xff] }
  0xd4   : > { %v2078_v18 = vpack.c.bf16 %v836_v13, %v833_v12  ;;  %v2017_v24 = vpack.c.bf16 %v512_v15, %v506_v14  ;;  %v854_v45 = vld [vmem:[#allocation9 + $0xb8] sm:$0xff]  ;;  %v554_v55 = vld [vmem:[#allocation8 + $0x208] sm:$0xff]  ;;  %v559_v61 = vld [vmem:[#allocation8 + $0x230] sm:$0xff] }
  0xd5   : > { %v2087_v49 = vpack.c.bf16 %v854_v45, %v851_v44  ;;  %v560_v56 = vld [vmem:[#allocation8 + $0x238] sm:$0xff]  ;;  %v863_v62 = vld [vmem:[#allocation9 + $0x100] sm:$0xff]  ;;  %v571_v6 = vld [vmem:[#allocation8 + $0x290] sm:$0xff] }
  0xd6   : > { %1980 = vmatpush1.bf16.msra.mxu1 %v1979_v19  ;;  %v505_v19 = vld [vmem:[#allocation8 + $0x80] sm:$0xff]  ;;  %v2033_v60 = vpack.c.bf16 %v560_v56, %v554_v55  ;;  %v866_v63 = vld [vmem:[#allocation9 + $0x118] sm:$0xff]  ;;  %v872_v9 = vld [vmem:[#allocation9 + $0x148] sm:$0xff] }
  0xd7   : > { %2014 = vmatprep.subr.bf16.mxu1 %v2013_v8  ;;  %v2019_v30 = vpack.c.bf16 %v511_v25, %v505_v19  ;;  %v2093_v3 = vpack.c.bf16 %v866_v63, %v863_v62  ;;  %v869_v8 = vld [vmem:[#allocation9 + $0x130] sm:$0xff]  ;;  %v578_v10 = vld [vmem:[#allocation8 + $0x2c8] sm:$0xff]  ;;  %v584_v12 = vld [vmem:[#allocation8 + $0x2f8] sm:$0xff] }
  0xd8   : > { %v2096_v14 = vpack.c.bf16 %v872_v9, %v869_v8  ;;  %v577_v15 = vld [vmem:[#allocation8 + $0x2c0] sm:$0xff]  ;;  %v878_v19 = vld [vmem:[#allocation9 + $0x178] sm:$0xff]  ;;  %v1062_v25 = vld [vmem:[#allocation9 + $0x188] sm:$0xff] }
  0xd9   : > { %v1068_v37 = vld [vmem:[#allocation9 + $0x1b8] sm:$0xff]  ;;  %v1071_v38 = vld [vmem:[#allocation9 + $0x1d0] sm:$0xff]  ;;  %v856_v8 = vld [vmem:[#allocation9 + $0xc8] sm:$0xff] }
  0xda   : > { %v2105_v45 = vpack.c.bf16 %v1071_v38, %v1068_v37  ;;  %v846_v55 = vld [vmem:[#allocation9 + $0x78] sm:$0xff]  ;;  %v1083_v63 = vld [vmem:[#allocation9 + $0x230] sm:$0xff]  ;;  %v859_v9 = vld [vmem:[#allocation9 + $0xe0] sm:$0xff] }
  0xdb   : > { %v1080_v62 = vld [vmem:[#allocation9 + $0x218] sm:$0xff]  ;;  %v871_v37 = vld [vmem:[#allocation9 + $0x140] sm:$0xff]  ;;  %v1098_v38 = vld [vmem:[#allocation9 + $0x2a8] sm:$0xff] }
 0x134   : > { %v398_v27 = vpop.permute.xlu0 %397 }
 0x135   : > { %vm399_vm2 = vcmp.eq.s32.totalorder %v2881_v23, %v398_v27  ;;  %v842_v27 = vld [vmem:[#allocation9 + $0x58] sm:$0xff] }
 0x136   : > { %1783 = vmatmul.mubr.msk.f32.vlgmr.msra.gmra.mrb[0].mxu0 %vm399_vm2, %v2609_v33 }
 0x137   : > { %1984 = vmatpush1.bf16.msra.mxu0 %v1983_v26  ;;  %752 = vmatprep.mubr.f32.mxu0 %v2608_v11  ;;  %v839_v26 = vld [vmem:[#allocation9 + $0x40] sm:$0xff] }
 0x138   : > { %1986 = vmatprep.subr.bf16.mxu0 %v1985_v28  ;;  %v518_v28 = vld [vmem:[#allocation8 + $0xe8] sm:$0xff]  ;;  %v2081_v31 = vpack.c.bf16 %v842_v27, %v839_v26  ;;  %v1065_v26 = vld [vmem:[#allocation9 + $0x1a0] sm:$0xff] }
 0x139   : > { %v2021_v33 = vpack.c.bf16 %v524_v29, %v518_v28  ;;  %v831_v29 = vld [vmem:[#allocation9] sm:$0xff] }
 0x13b   : > { %1988 = vmatpush1.bf16.msra.mxu0 %v1987_v34  ;;  %v523_v34 = vld [vmem:[#allocation8 + $0x110] sm:$0xff] }
 0x13c   : > { %1990 = vmatprep.subr.bf16.mxu0 %v1989_v35  ;;  %v845_v35 = vld [vmem:[#allocation9 + $0x70] sm:$0xff]  ;;  %v2023_v39 = vpack.c.bf16 %v523_v34, %v517_v32  ;;  %v2101_v32 = vpack.c.bf16 %v1065_v26, %v1062_v25  ;;  %v1064_v34 = vld [vmem:[#allocation9 + $0x198] sm:$0xff] }
 0x13d   : > { %v865_v25 = vld [vmem:[#allocation9 + $0x110] sm:$0xff]  ;;  %v1092_v26 = vld [vmem:[#allocation9 + $0x278] sm:$0xff] }
 0x13f   : > { %1992 = vmatpush1.bf16.msra.mxu0 %v1991_v40  ;;  %v2084_v40 = vpack.c.bf16 %v848_v36, %v845_v35  ;;  %v838_v35 = vld [vmem:[#allocation9 + $0x38] sm:$0xff]  ;;  %v841_v36 = vld [vmem:[#allocation9 + $0x50] sm:$0xff] }
 0x140   : > { %1994 = vmatprep.subr.bf16.mxu0 %v1993_v41  ;;  %v529_v41 = vld [vmem:[#allocation8 + $0x140] sm:$0xff]  ;;  %v2049_v44 = vpack.c.bf16 %v841_v36, %v838_v35  ;;  %v1094_v35 = vld [vmem:[#allocation9 + $0x288] sm:$0xff] }
 0x141   : > { %v2027_v48 = vpack.c.bf16 %v535_v43, %v529_v41  ;;  %v840_v43 = vld [vmem:[#allocation9 + $0x48] sm:$0xff] }
 0x142   : > { %v868_v36 = vld [vmem:[#allocation9 + $0x128] sm:$0xff] }
 0x143   : > { %1996 = vmatpush1.bf16.msra.mxu0 %v1995_v46  ;;  %v542_v46 = vld [vmem:[#allocation8 + $0x1a8] sm:$0xff] }
 0x144   : > { %1998 = vmatprep.subr.bf16.mxu0 %v1997_v47  ;;  %v548_v47 = vld [vmem:[#allocation8 + $0x1d8] sm:$0xff] }
 0x145   : > { %v2029_v51 = vpack.c.bf16 %v548_v47, %v542_v46  ;;  %v1067_v46 = vld [vmem:[#allocation9 + $0x1b0] sm:$0xff]  ;;  %v1070_v47 = vld [vmem:[#allocation9 + $0x1c8] sm:$0xff] }
 0x147   : > { %2000 = vmatpush1.bf16.msra.mxu0 %v1999_v52  ;;  %v547_v52 = vld [vmem:[#allocation8 + $0x1d0] sm:$0xff] }
 0x148   : > { %2002 = vmatprep.subr.bf16.mxu0 %v2001_v53  ;;  %v857_v53 = vld [vmem:[#allocation9 + $0xd0] sm:$0xff]  ;;  %v2031_v57 = vpack.c.bf16 %v547_v52, %v541_v50  ;;  %v1074_v50 = vld [vmem:[#allocation9 + $0x1e8] sm:$0xff] }
 0x14b   : > { %2004 = vmatpush1.bf16.msra.mxu0 %v2003_v58  ;;  %v2090_v58 = vpack.c.bf16 %v860_v54, %v857_v53  ;;  %v2107_v53 = vpack.c.bf16 %v1070_v47, %v1067_v46  ;;  %v843_v54 = vld [vmem:[#allocation9 + $0x60] sm:$0xff] }
 0x14c   : > { %2006 = vmatprep.subr.bf16.mxu0 %v2005_v59  ;;  %v553_v59 = vld [vmem:[#allocation8 + $0x200] sm:$0xff] }
 0x14d   : > { %v2035_v2 = vpack.c.bf16 %v559_v61, %v553_v59  ;;  %v1076_v59 = vld [vmem:[#allocation9 + $0x1f8] sm:$0xff]  ;;  %v853_v61 = vld [vmem:[#allocation9 + $0xb0] sm:$0xff]  ;;  %v1097_v47 = vld [vmem:[#allocation9 + $0x2a0] sm:$0xff] }
 0x14f   : > { %2008 = vmatpush1.bf16.msra.mxu0 %v2007_v0  ;;  %v566_v0 = vld [vmem:[#allocation8 + $0x268] sm:$0xff] }
 0x150   : > { %2010 = vmatprep.subr.bf16.mxu0 %v2009_v1  ;;  %v572_v1 = vld [vmem:[#allocation8 + $0x298] sm:$0xff] }
 0x151   : > { %v2037_v5 = vpack.c.bf16 %v572_v1, %v566_v0  ;;  %v849_v1 = vld [vmem:[#allocation9 + $0x90] sm:$0xff] }
 0x153   : > { %2012 = vmatpush1.bf16.msra.mxu0 %v2011_v4  ;;  %v565_v4 = vld [vmem:[#allocation8 + $0x260] sm:$0xff] }
 0x154   : > { %2077 = vmatprep.subr.bf16.mxu0 %v2606_v7  ;;  %v2039_v13 = vpack.c.bf16 %v571_v6, %v565_v4  ;;  %v2113_v4 = vpack.c.bf16 %v1083_v63, %v1080_v62  ;;  %v1082_v6 = vld [vmem:[#allocation9 + $0x228] sm:$0xff]  ;;  %v1063_v63 = vld [vmem:[#allocation9 + $0x190] sm:$0xff] }
 0x209   : > { %v484_v16 = vpop.f32.mrb[0].mxu0 }
 0x20a   : > { %v2886_v21 = vmax.f32 %v484_v16, 0.0  ;;  %v1784_v22 = vpop.f32.mrb[1].mxu0  ;;  %v583_v16 = vld [vmem:[#allocation8 + $0x2f0] sm:$0xff] }
 0x20b   : > { %v832_v22 = vld [vmem:[#allocation9 + $0x8] sm:$0xff]  ;;  %v2043_v27 = vpack.c.bf16 %v583_v16, %v577_v15  ;;  %v855_v15 = vld [vmem:[#allocation9 + $0xc0] sm:$0xff]  ;;  %v858_v16 = vld [vmem:[#allocation9 + $0xd8] sm:$0xff] }
 0x20c   : > { %682 = vmatmul.mubr.f32.vlgmr.msra.gmra.mrb[0].mxu1 %v2886_v21  ;;  %753 = vmatmul.mubr.f32.vlgmr.msra.gmra.mrb[2].mxu0 %v2886_v21 }
 0x20d   : > { %2016 = vmatpush1.bf16.msra.mxu1 %v2015_v17  ;;  %2079 = vmatpush3.bf16.msra.mxu0 %v2078_v18  ;;  %v2041_v17 = vpack.c.bf16 %v584_v12, %v578_v10  ;;  %v875_v18 = vld [vmem:[#allocation9 + $0x160] sm:$0xff]  ;;  %v1086_v10 = vld [vmem:[#allocation9 + $0x248] sm:$0xff] }
 0x20e   : > { %2018 = vmatprep.subr.bf16.mxu1 %v2017_v24  ;;  %2080 = vmatprep.subr.bf16.mxu0 %v2606_v7  ;;  %v835_v24 = vld [vmem:[#allocation9 + $0x20] sm:$0xff]  ;;  %v2099_v28 = vpack.c.bf16 %v878_v19, %v875_v18 }
 0x20f   : > { %823 = vmatprep.mubr.f32.mxu1 %v2608_v11  ;;  %1817 = vmatprep.mubr.msk.f32.mxu0 %vm2607_vm1, %v2608_v11  ;;  %v1089_v12 = vld [vmem:[#allocation9 + $0x260] sm:$0xff] }
 0x210   : > { %v2117_v18 = vpack.c.bf16 %v1089_v12, %v1086_v10  ;;  %v1085_v19 = vld [vmem:[#allocation9 + $0x240] sm:$0xff]  ;;  %v1084_v10 = vld [vmem:[#allocation9 + $0x238] sm:$0xff] }
 0x211   : > { %2020 = vmatpush1.bf16.msra.mxu1 %v2019_v30  ;;  %2082 = vmatpush3.bf16.msra.mxu0 %v2081_v31  ;;  %v834_v30 = vld [vmem:[#allocation9 + $0x18] sm:$0xff]  ;;  %v2045_v31 = vpack.c.bf16 %v835_v24, %v832_v22 }
 0x212   : > { %2022 = vmatprep.subr.bf16.mxu1 %v2021_v33  ;;  %2083 = vmatprep.subr.bf16.mxu0 %v2606_v7  ;;  %v1061_v33 = vld [vmem:[#allocation9 + $0x180] sm:$0xff]  ;;  %v1088_v22 = vld [vmem:[#allocation9 + $0x258] sm:$0xff] }
 0x213   : > { %v2103_v41 = vpack.c.bf16 %v1064_v34, %v1061_v33  ;;  %v862_v24 = vld [vmem:[#allocation9 + $0xf8] sm:$0xff]  ;;  %v1091_v34 = vld [vmem:[#allocation9 + $0x270] sm:$0xff] }
 0x215   : > { %2024 = vmatpush1.bf16.msra.mxu1 %v2023_v39  ;;  %2085 = vmatpush3.bf16.msra.mxu0 %v2084_v40  ;;  %v2047_v39 = vpack.c.bf16 %v834_v30, %v831_v29  ;;  %v2900_v40 = vld [vmem:[#allocation13] sm:$0xff]  ;;  %v2119_v29 = vpack.c.bf16 %v1088_v22, %v1085_v19  ;;  %v1102_v22 = vld [vmem:[#allocation9 + $0x2c8] sm:$0xff] }
 0x216   : > { %2026 = vmatprep.subr.bf16.mxu1 %v2025_v42  ;;  %2086 = vmatprep.subr.bf16.mxu0 %v2606_v7  ;;  %v837_v42 = vld [vmem:[#allocation9 + $0x30] sm:$0xff] }
 0x217   : > { %v2051_v52 = vpack.c.bf16 %v840_v43, %v837_v42  ;;  %v861_v30 = vld [vmem:[#allocation9 + $0xf0] sm:$0xff]  ;;  %v2123_v42 = vpack.c.bf16 %v1094_v35, %v1091_v34  ;;  %v867_v43 = vld [vmem:[#allocation9 + $0x120] sm:$0xff]  ;;  %v1309_v35 = vld [vmem:[#allocation11 + $0x88] sm:$0xff] }
 0x218   : > { %v1099_v19 = vld [vmem:[#allocation9 + $0x2b0] sm:$0xff]  ;;  %v1308_v34 = vld [vmem:[#allocation11 + $0x80] sm:$0xff] }
 0x219   : > { %2028 = vmatpush1.bf16.msra.mxu1 %v2027_v48  ;;  %2088 = vmatpush3.bf16.msra.mxu0 %v2087_v49  ;;  %v844_v48 = vld [vmem:[#allocation9 + $0x68] sm:$0xff]  ;;  %v847_v49 = vld [vmem:[#allocation9 + $0x80] sm:$0xff] }
 0x21a   : > { %2030 = vmatprep.subr.bf16.mxu1 %v2029_v51  ;;  %2089 = vmatprep.subr.bf16.mxu0 %v2606_v7  ;;  %v1077_v51 = vld [vmem:[#allocation9 + $0x200] sm:$0xff]  ;;  %v2053_v56 = vpack.c.bf16 %v847_v49, %v844_v48  ;;  %v1100_v48 = vld [vmem:[#allocation9 + $0x2b8] sm:$0xff] }
 0x21b   : > { %v874_v49 = vld [vmem:[#allocation9 + $0x158] sm:$0xff] }
 0x21d   : > { %2032 = vmatpush1.bf16.msra.mxu1 %v2031_v57  ;;  %2091 = vmatpush3.bf16.msra.mxu0 %v2090_v58  ;;  %v2109_v57 = vpack.c.bf16 %v1077_v51, %v1074_v50  ;;  %v1073_v58 = vld [vmem:[#allocation9 + $0x1e0] sm:$0xff]  ;;  %v877_v50 = vld [vmem:[#allocation9 + $0x170] sm:$0xff]  ;;  %v1104_v51 = vld [vmem:[#allocation9 + $0x2d8] sm:$0xff] }
 0x21e   : > { %2034 = vmatprep.subr.bf16.mxu1 %v2033_v60  ;;  %2092 = vmatprep.subr.bf16.mxu0 %v2606_v7  ;;  %v850_v60 = vld [vmem:[#allocation9 + $0x98] sm:$0xff]  ;;  %v2111_v0 = vpack.c.bf16 %v1076_v59, %v1073_v58  ;;  %v876_v58 = vld [vmem:[#allocation9 + $0x168] sm:$0xff]  ;;  %v1103_v59 = vld [vmem:[#allocation9 + $0x2d0] sm:$0xff] }
 0x221   : > { %2036 = vmatpush1.bf16.msra.mxu1 %v2035_v2  ;;  %2094 = vmatpush3.bf16.msra.mxu0 %v2093_v3  ;;  %v852_v2 = vld [vmem:[#allocation9 + $0xa8] sm:$0xff]  ;;  %v2057_v3 = vpack.c.bf16 %v853_v61, %v850_v60 }
 0x222   : > { %2038 = vmatprep.subr.bf16.mxu1 %v2037_v5  ;;  %2095 = vmatprep.subr.bf16.mxu0 %v2606_v7  ;;  %v1079_v5 = vld [vmem:[#allocation9 + $0x210] sm:$0xff]  ;;  %v1106_v60 = vld [vmem:[#allocation9 + $0x2e8] sm:$0xff] }
 0x223   : > { %v2131_v62 = vpack.c.bf16 %v1106_v60, %v1103_v59  ;;  %v1317_v59 = vld [vmem:[#allocation11 + $0xc8] sm:$0xff] }
 0x225   : > { %2040 = vmatpush1.bf16.msra.mxu1 %v2039_v13  ;;  %2097 = vmatpush3.bf16.msra.mxu0 %v2096_v14  ;;  %v2059_v13 = vpack.c.bf16 %v852_v2, %v849_v1  ;;  %v2115_v14 = vpack.c.bf16 %v1082_v6, %v1079_v5  ;;  %v1069_v2 = vld [vmem:[#allocation9 + $0x1c0] sm:$0xff]  ;;  %v1075_v5 = vld [vmem:[#allocation9 + $0x1f0] sm:$0xff]  ;;  %v1078_v6 = vld [vmem:[#allocation9 + $0x208] sm:$0xff] }
 0x226   : > { %2042 = vmatprep.subr.bf16.mxu1 %v2041_v17  ;;  %2098 = vmatprep.subr.bf16.mxu0 %v2606_v7  ;;  %v2061_v17 = vpack.c.bf16 %v859_v9, %v856_v8  ;;  %v2140_v8 = vpack.c.bf16 %v1078_v6, %v1075_v5  ;;  %v1081_v9 = vld [vmem:[#allocation9 + $0x220] sm:$0xff]  ;;  %v1321_v6 = vld [vmem:[#allocation11 + $0xe8] sm:$0xff] }
 0x227   : > { %v2143_v12 = vpack.c.bf16 %v1084_v10, %v1081_v9  ;;  %v1320_v5 = vld [vmem:[#allocation11 + $0xe0] sm:$0xff]  ;;  %v1322_v10 = vld [vmem:[#allocation11 + $0xf0] sm:$0xff] }
 0x228   : > { %v2176_v9 = vpack.c.bf16 %v1321_v6, %v1320_v5 }
 0x229   : > { %2044 = vmatpush1.bf16.msra.mxu1 %v2043_v27  ;;  %2100 = vmatpush3.bf16.msra.mxu0 %v2099_v28  ;;  %v1095_v27 = vld [vmem:[#allocation9 + $0x290] sm:$0xff]  ;;  %v2063_v28 = vpack.c.bf16 %v858_v16, %v855_v15  ;;  %v1093_v16 = vld [vmem:[#allocation9 + $0x280] sm:$0xff] }
 0x22a   : > { %2046 = vmatprep.subr.bf16.mxu1 %v2045_v31  ;;  %2102 = vmatprep.subr.bf16.mxu0 %v2101_v32  ;;  %v864_v31 = vld [vmem:[#allocation9 + $0x108] sm:$0xff]  ;;  %v2065_v32 = vpack.c.bf16 %v865_v25, %v862_v24  ;;  %v2121_v33 = vpack.c.bf16 %v1095_v27, %v1092_v26  ;;  %v2152_v24 = vpack.c.bf16 %v1102_v22, %v1099_v19  ;;  %v1105_v25 = vld [vmem:[#allocation9 + $0x2e0] sm:$0xff]  ;;  %v1108_v26 = vld [vmem:[#allocation9 + $0x2f8] sm:$0xff] }
 0x22b   : > { %v2155_v27 = vpack.c.bf16 %v1108_v26, %v1105_v25 }
 0x22c   : > { %824 = vmatmul.mubr.f32.vlgmr.msra.gmra.mrb[2].mxu1 %v2886_v21  ;;  %1818 = vmatmul.mubr.f32.vlgmr.msra.gmra.mrb[4].mxu0 %v2900_v40  ;;  %v2055_v21 = vpack.c.bf16 %v846_v55, %v843_v54  ;;  %v2127_v54 = vpack.c.bf16 %v1100_v48, %v1097_v47  ;;  %v873_v55 = vld [vmem:[#allocation9 + $0x150] sm:$0xff]  ;;  %v1313_v47 = vld [vmem:[#allocation11 + $0xa8] sm:$0xff] }
 0x22d   : > { %2048 = vmatpush1.bf16.msra.mxu1 %v2047_v39  ;;  %2104 = vmatpush1.bf16.msra.mxu0 %v2103_v41  ;;  %v1101_v39 = vld [vmem:[#allocation9 + $0x2c0] sm:$0xff]  ;;  %v2067_v41 = vpack.c.bf16 %v864_v31, %v861_v30  ;;  %v2075_v61 = vpack.c.bf16 %v876_v58, %v873_v55  ;;  %v1293_v31 = vld [vmem:[#allocation11 + $0x10] sm:$0xff] }
 0x22e   : > { %2050 = vmatprep.subr.bf16.mxu1 %v2049_v44  ;;  %2106 = vmatprep.subr.bf16.mxu0 %v2105_v45  ;;  %v870_v44 = vld [vmem:[#allocation9 + $0x138] sm:$0xff]  ;;  %v2069_v45 = vpack.c.bf16 %v871_v37, %v868_v36  ;;  %v2125_v46 = vpack.c.bf16 %v1101_v39, %v1098_v38  ;;  %v2158_v36 = vpack.c.bf16 %v1309_v35, %v1308_v34  ;;  %v1295_v37 = vld [vmem:[#allocation11 + $0x20] sm:$0xff]  ;;  %v1296_v38 = vld [vmem:[#allocation11 + $0x28] sm:$0xff] }
 0x22f   : > { %960 = vmatprep.mubr.f32.mxu1 %v2608_v11  ;;  %1191 = vmatprep.mubr.f32.mxu0 %v2608_v11  ;;  %v2188_v39 = vpack.c.bf16 %v1296_v38, %v1295_v37  ;;  %v1301_v55 = vld [vmem:[#allocation11 + $0x50] sm:$0xff]  ;;  %v1316_v58 = vld [vmem:[#allocation11 + $0xc0] sm:$0xff] }
 0x230   : > { %v2170_v60 = vpack.c.bf16 %v1317_v59, %v1316_v58 }
 0x231   : > { %2052 = vmatpush1.bf16.msra.mxu1 %v2051_v52  ;;  %2108 = vmatpush1.bf16.msra.mxu0 %v2107_v53  ;;  %v1107_v52 = vld [vmem:[#allocation9 + $0x2f0] sm:$0xff]  ;;  %v2071_v53 = vpack.c.bf16 %v870_v44, %v867_v43  ;;  %v1298_v44 = vld [vmem:[#allocation11 + $0x38] sm:$0xff] }
 0x232   : > { %2054 = vmatprep.subr.bf16.mxu1 %v2053_v56  ;;  %2110 = vmatprep.subr.bf16.mxu0 %v2109_v57  ;;  %v2073_v56 = vpack.c.bf16 %v877_v50, %v874_v49  ;;  %v2129_v57 = vpack.c.bf16 %v1107_v52, %v1104_v51  ;;  %v1297_v43 = vld [vmem:[#allocation11 + $0x30] sm:$0xff]  ;;  %v1299_v49 = vld [vmem:[#allocation11 + $0x40] sm:$0xff]  ;;  %v1300_v50 = vld [vmem:[#allocation11 + $0x48] sm:$0xff] }
 0x233   : > { %v2194_v51 = vpack.c.bf16 %v1300_v50, %v1299_v49  ;;  %v1314_v52 = vld [vmem:[#allocation11 + $0xb0] sm:$0xff] }
 0x235   : > { %2056 = vmatpush1.bf16.msra.mxu1 %v2055_v21  ;;  %2112 = vmatpush1.bf16.msra.mxu0 %v2111_v0  ;;  %v1066_v21 = vld [vmem:[#allocation9 + $0x1a8] sm:$0xff]  ;;  %v2906_v0 = vld [vmem:[#allocation13 + $0x8] sm:$0xff] }
 0x236   : > { %2058 = vmatprep.subr.bf16.mxu1 %v2057_v3  ;;  %2114 = vmatprep.subr.bf16.mxu0 %v2113_v4  ;;  %v2134_v1 = vpack.c.bf16 %v1066_v21, %v1063_v63  ;;  %v1072_v3 = vld [vmem:[#allocation9 + $0x1d8] sm:$0xff]  ;;  %v1318_v21 = vld [vmem:[#allocation11 + $0xd0] sm:$0xff] }
 0x237   : > { %v2137_v4 = vpack.c.bf16 %v1072_v3, %v1069_v2  ;;  %v1305_v2 = vld [vmem:[#allocation11 + $0x70] sm:$0xff] }
 0x239   : > { %2060 = vmatpush1.bf16.msra.mxu1 %v2059_v13  ;;  %2116 = vmatpush1.bf16.msra.mxu0 %v2115_v14  ;;  %v1087_v13 = vld [vmem:[#allocation9 + $0x250] sm:$0xff]  ;;  %v1090_v14 = vld [vmem:[#allocation9 + $0x268] sm:$0xff] }
 0x23a   : > { %2062 = vmatprep.subr.bf16.mxu1 %v2061_v17  ;;  %2118 = vmatprep.subr.bf16.mxu0 %v2117_v18  ;;  %v2146_v15 = vpack.c.bf16 %v1090_v14, %v1087_v13  ;;  %v1096_v17 = vld [vmem:[#allocation9 + $0x298] sm:$0xff]  ;;  %v588_v14 = vshrl.u32 %v393_v20, 7  ;;  %v879_v20 = vld [vmem:[%s3045_s5] sm:$0x7] }
 0x23b   : > { %v2149_v18 = vpack.c.bf16 %v1096_v17, %v1093_v16  ;;  %v585_v16 = vld [vmem:[%s3043_s3] sm:$0x3f] }
 0x23c   : > { %v601_v17 = vsub.s32 3, %v588_v14  ;;  %v605_v26 = vsub.s32 4, %v588_v14  ;;  %v589_v38 = vsub.s32 0, %v588_v14 }
 0x23d   : > { %2064 = vmatpush1.bf16.msra.mxu1 %v2063_v28  ;;  %2120 = vmatpush1.bf16.msra.mxu0 %v2119_v29  ;;  %v1291_v28 = vld [vmem:[#allocation11] sm:$0xff]  ;;  %v1292_v29 = vld [vmem:[#allocation11 + $0x8] sm:$0xff] }
 0x23e   : > { %2066 = vmatprep.subr.bf16.mxu1 %v2065_v32  ;;  %2122 = vmatprep.subr.bf16.mxu0 %v2121_v33  ;;  %v2182_v30 = vpack.c.bf16 %v1292_v29, %v1291_v28  ;;  %v1294_v32 = vld [vmem:[#allocation11 + $0x18] sm:$0xff]  ;;  %v602_v19 = vrot.slane %v585_v16, %v601_v17  ;;  %v606_v28 = vrot.slane %v585_v16, %v605_v26 }
 0x23f   : > { %v2185_v33 = vpack.c.bf16 %v1294_v32, %v1293_v31 }
 0x241   : > { %2068 = vmatpush1.bf16.msra.mxu1 %v2067_v41  ;;  %2124 = vmatpush1.bf16.msra.mxu0 %v2123_v42  ;;  %v1311_v41 = vld [vmem:[#allocation11 + $0x98] sm:$0xff] }
 0x242   : > { %2070 = vmatprep.subr.bf16.mxu1 %v2069_v45  ;;  %2126 = vmatprep.subr.bf16.mxu0 %v2125_v46  ;;  %v2191_v45 = vpack.c.bf16 %v1298_v44, %v1297_v43  ;;  %v1312_v46 = vld [vmem:[#allocation11 + $0xa0] sm:$0xff] }
 0x243   : > { %v2164_v48 = vpack.c.bf16 %v1313_v47, %v1312_v46 }
 0x245   : > { %2072 = vmatpush1.bf16.msra.mxu1 %v2071_v53  ;;  %2128 = vmatpush1.bf16.msra.mxu0 %v2127_v54  ;;  %v1315_v53 = vld [vmem:[#allocation11 + $0xb8] sm:$0xff] }
 0x246   : > { %2074 = vmatprep.subr.bf16.mxu1 %v2073_v56  ;;  %2130 = vmatprep.subr.bf16.mxu0 %v2129_v57  ;;  %v2167_v54 = vpack.c.bf16 %v1315_v53, %v1314_v52  ;;  %v1302_v56 = vld [vmem:[#allocation11 + $0x58] sm:$0xff] }
 0x247   : > { %v2197_v57 = vpack.c.bf16 %v1302_v56, %v1301_v55 }
 0x249   : > { %2076 = vmatpush1.bf16.msra.mxu1 %v2075_v61  ;;  %2132 = vmatpush1.bf16.msra.mxu0 %v2131_v62  ;;  %v1303_v61 = vld [vmem:[#allocation11 + $0x60] sm:$0xff]  ;;  %v1304_v62 = vld [vmem:[#allocation11 + $0x68] sm:$0xff] }
 0x24a   : > { %2133 = vmatprep.subr.bf16.mxu1 %v2606_v7  ;;  %2157 = vmatprep.subr.bf16.mxu0 %v2606_v7  ;;  %v2200_v63 = vpack.c.bf16 %v1304_v62, %v1303_v61 }
 0x24c   : > { %961 = vmatmul.mubr.f32.vlgmr.msra.gmra.mrb[0].mxu1 %v2900_v40  ;;  %1192 = vmatmul.mubr.f32.vlgmr.msra.gmra.mrb[6].mxu0 %v2906_v0 }
 0x24d   : > { %2135 = vmatpush3.bf16.msra.mxu1 %v2134_v1  ;;  %1852 = vmatprep.mubr.msk.f32.mxu1 %vm2607_vm1, %v2608_v11  ;;  %v1319_v1 = vld [vmem:[#allocation11 + $0xd8] sm:$0xff] }
 0x24e   : > { %2136 = vmatprep.subr.bf16.mxu1 %v2606_v7  ;;  %1887 = vmatprep.mubr.msk.f32.mxu0 %vm2607_vm1, %v2608_v11  ;;  %v2173_v3 = vpack.c.bf16 %v1319_v1, %v1318_v21 }
 0x24f   : > { %2159 = vmatpush3.bf16.msra.mxu0 %v2158_v36 }
 0x250   : > { %2160 = vmatprep.subr.bf16.mxu0 %v2606_v7 }
 0x251   : > { %2138 = vmatpush3.bf16.msra.mxu1 %v2137_v4  ;;  %v1306_v4 = vld [vmem:[#allocation11 + $0x78] sm:$0xff] }
 0x252   : > { %2139 = vmatprep.subr.bf16.mxu1 %v2606_v7 }
 0x255   : > { %2141 = vmatpush3.bf16.msra.mxu1 %v2140_v8  ;;  %v2203_v8 = vpack.c.bf16 %v1306_v4, %v1305_v2 }
 0x256   : > { %2142 = vmatprep.subr.bf16.mxu1 %v2606_v7 }
 0x259   : > { %2144 = vmatpush3.bf16.msra.mxu1 %v2143_v12  ;;  %v1323_v12 = vld [vmem:[#allocation11 + $0xf8] sm:$0xff] }
 0x25a   : > { %2145 = vmatprep.subr.bf16.mxu1 %v2606_v7  ;;  %v2179_v13 = vpack.c.bf16 %v1323_v12, %v1322_v10 }
 0x25d   : > { %2147 = vmatpush3.bf16.msra.mxu1 %v2146_v15  ;;  %v2942_v15 = vsub.s32 2, %v588_v14 }
 0x25e   : > { %2148 = vmatprep.subr.bf16.mxu1 %v2606_v7 }
 0x25f   : > { %v892_v29 = vrot.slane %v879_v20, %v2942_v15 }
 0x261   : > { %2150 = vmatpush3.bf16.msra.mxu1 %v2149_v18  ;;  %v598_v18 = vrot.slane %v585_v16, %v2942_v15 }
 0x262   : > { %2151 = vmatprep.subr.bf16.mxu1 %v2606_v7 }
 0x265   : > { %2153 = vmatpush3.bf16.msra.mxu1 %v2152_v24 }
 0x266   : > { %2154 = vmatprep.subr.bf16.mxu1 %v2606_v7 }
 0x269   : > { %2156 = vmatpush3.bf16.msra.mxu1 %v2155_v27  ;;  %v609_v27 = vsub.s32 5, %v588_v14 }
 0x26a   : > { %2181 = vmatprep.subr.bf16.mxu1 %v2606_v7 }
 0x26c   : > { %1853 = vmatmul.mubr.f32.vlgmr.msra.gmra.mrb[4].mxu1 %v2906_v0 }
 0x26d   : > { %1922 = vmatprep.mubr.msk.f32.mxu1 %vm2607_vm1, %v2608_v11  ;;  %2183 = vmatpush3.bf16.msra.mxu1 %v2182_v30  ;;  %v1310_v11 = vld [vmem:[#allocation11 + $0x90] sm:$0xff]  ;;  %v610_v30 = vrot.slane %v585_v16, %v609_v27 }
 0x26e   : > { %2184 = vmatprep.subr.bf16.mxu1 %v2606_v7  ;;  %v2161_v42 = vpack.c.bf16 %v1311_v41, %v1310_v11  ;;  %v590_v11 = vrot.slane %v585_v16, %v589_v38  ;;  %v884_v41 = vrot.slane %v879_v20, %v589_v38 }
 0x270   : > { %2162 = vmatpush3.bf16.msra.mxu0 %v2161_v42  ;;  %v1655_v42 = vld [vmem:[%s3045_s5 + $0x3] sm:$0x7] }
 0x271   : > { %2186 = vmatpush3.bf16.msra.mxu1 %v2185_v33  ;;  %2163 = vmatprep.subr.bf16.mxu0 %v2606_v7  ;;  %v1115_v46 = vrot.slane %v1655_v42, %v589_v38 }
 0x272   : > { %2187 = vmatprep.subr.bf16.mxu1 %v2606_v7 }
 0x274   : > { %2165 = vmatpush3.bf16.msra.mxu0 %v2164_v48 }
 0x275   : > { %2189 = vmatpush3.bf16.msra.mxu1 %v2188_v39  ;;  %2166 = vmatprep.subr.bf16.mxu0 %v2606_v7  ;;  %v593_v39 = vsub.s32 1, %v588_v14 }
 0x276   : > { %2190 = vmatprep.subr.bf16.mxu1 %v2606_v7 }
 0x277   : > { %v594_v43 = vrot.slane %v585_v16, %v593_v39  ;;  %v888_v44 = vrot.slane %v879_v20, %v593_v39  ;;  %v1119_v48 = vrot.slane %v1655_v42, %v593_v39 }
 0x278   : > { %2168 = vmatpush3.bf16.msra.mxu0 %v2167_v54 }
 0x279   : > { %2192 = vmatpush3.bf16.msra.mxu1 %v2191_v45  ;;  %2169 = vmatprep.subr.bf16.mxu0 %v2606_v7  ;;  %v2205_v45 = vadd.f32 %v884_v41, %v590_v11  ;;  %v2207_v47 = vadd.f32 %v888_v44, %v594_v43 }
 0x27a   : > { %2193 = vmatprep.subr.bf16.mxu1 %v2606_v7 }
 0x27c   : > { %2171 = vmatpush3.bf16.msra.mxu0 %v2170_v60 }
 0x27d   : > { %2195 = vmatpush3.bf16.msra.mxu1 %v2194_v51  ;;  %2172 = vmatprep.subr.bf16.mxu0 %v2606_v7 }
 0x27e   : > { %2196 = vmatprep.subr.bf16.mxu1 %v2606_v7 }
 0x280   : > { %2174 = vmatpush3.bf16.msra.mxu0 %v2173_v3 }
 0x281   : > { %2198 = vmatpush3.bf16.msra.mxu1 %v2197_v57  ;;  %2175 = vmatprep.subr.bf16.mxu0 %v2606_v7 }
 0x282   : > { %2199 = vmatprep.subr.bf16.mxu1 %v2606_v7 }
 0x284   : > { %2177 = vmatpush3.bf16.msra.mxu0 %v2176_v9  ;;  %v1123_v9 = vrot.slane %v1655_v42, %v2942_v15 }
 0x285   : > { %2201 = vmatpush3.bf16.msra.mxu1 %v2200_v63  ;;  %2178 = vmatprep.subr.bf16.mxu0 %v2606_v7 }
 0x286   : > { %2202 = vmatprep.subr.bf16.mxu1 %v2606_v7 }
 0x288   : > { %2180 = vmatpush3.bf16.msra.mxu0 %v2179_v13 }
 0x289   : > { %2204 = vmatpush3.bf16.msra.mxu1 %v2203_v8 }
 0x2df   : > { %v754_v22 = vpop.f32.mrb[2].mxu0 }
 0x2e0   : > { %v755_v24 = vadd.f32 %v754_v22, %v598_v18  ;;  %v756_v25 = vpop.f32.mrb[3].mxu0 }
 0x2e1   : > { %v757_v7 = vadd.f32 %v756_v25, %v602_v19 }
 0x2ff   : > { %v825_v31 = vpop.f32.mrb[2].mxu1  ;;  %v1033_v32 = vpop.f32.mrb[4].mxu0 }
 0x300   : > { %v826_v33 = vadd.f32 %v825_v31, %v606_v28  ;;  %v827_v34 = vpop.f32.mrb[3].mxu1  ;;  %v1034_v35 = vadd.f32 %v1033_v32, %v892_v29  ;;  %v1819_v36 = vpop.f32.mrb[5].mxu0 }
 0x301   : > { %v828_v37 = vadd.f32 %v827_v34, %v610_v30 }
 0x31f   : > { %v962_v49 = vpop.f32.mrb[0].mxu1  ;;  %v1193_v50 = vpop.f32.mrb[6].mxu0 }
 0x320   : > { %v2206_v51 = vadd.f32 %v2205_v45, %v962_v49  ;;  %v1194_v52 = vadd.f32 %v1193_v50, %v1115_v46  ;;  %v964_v53 = vpop.f32.mrb[1].mxu1  ;;  %v1195_v54 = vpop.f32.mrb[7].mxu0 }
 0x321   : > { %v2208_v55 = vadd.f32 %v2207_v47, %v964_v53  ;;  %v1196_v56 = vadd.f32 %v1195_v54, %v1119_v48 }
 0x322   : > { %v1653_v57 = vmul.f32 -1.442695, %v2206_v51  ;;  %v1268_v58 = vadd.f32 %v1194_v52, %v757_v7 }
 0x323   : > { %v1275_v59 = vadd.f32 %v1196_v56, %v826_v33  ;;  %v1654_v61 = vmul.f32 -1.442695, %v2208_v55 }
 0x324   : > { %2323 = vpow2.f32 %v1653_v57  ;;  %v1656_v60 = vmul.f32 -1.442695, %v1268_v58 }
 0x325   : > { %v1657_v62 = vmul.f32 -1.442695, %v1275_v59 }
 0x326   : > { %2325 = vpow2.f32 %v1656_v60 }
 0x327   : > { %2327 = vpow2.f32 %v1654_v61 }
 0x328   : > { %2329 = vpow2.f32 %v1657_v62 }
 0x32e   : > { %v2324_v63 = vpop.eup %2323 }
 0x32f   : > { %v1041_v21 = vadd.f32 1.0, %v2324_v63 }
 0x330   : > { %v2326_v1 = vpop.eup %2325 }
 0x331   : > { %2331 = vrcp.f32 %v1041_v21  ;;  %v1272_v2 = vadd.f32 1.0, %v2326_v1  ;;  %v2328_v3 = vpop.eup %2327 }
 0x332   : > { %v1048_v4 = vadd.f32 1.0, %v2328_v3  ;;  %v2330_v5 = vpop.eup %2329 }
 0x333   : > { %2333 = vrcp.f32 %v1272_v2  ;;  %v1279_v12 = vadd.f32 1.0, %v2330_v5 }
 0x334   : > { %2335 = vrcp.f32 %v1048_v4 }
 0x33b   : > { %v2332_v6 = vpop.eup %2331 }
 0x33c   : > { %v1051_v8 = vmul.f32 %v2332_v6, %v1034_v35  ;;  %v1658_v35 = vld [vmem:[%s3047_s7] ss:$0 sm:$0xff] }
 0x33d   : > { %v2334_v17 = vpop.eup %2333 }
 0x33e   : > { %v1052_v10 = vadd.f32 %v1051_v8, %v755_v24  ;;  %v2336_v22 = vpop.eup %2335 }
 0x33f   : > { %v1264_v13 = vpop.f32.mrb[4].mxu1  ;;  %v1054_v25 = vsub.f32 1.0, %v2336_v22  ;;  %v1056_v27 = vmul.f32 %v2336_v22, %v2900_v40 }
 0x340   : > { %2337 = vtanh.f32 %v1052_v10  ;;  %v1265_v14 = vadd.f32 %v1264_v13, %v1123_v9  ;;  %v1854_v16 = vpop.f32.mrb[5].mxu1 }
 0x341   : > { %2339 = vrcp.f32 %v1279_v12 }
 0x342   : > { %v1282_v18 = vmul.f32 %v2334_v17, %v1265_v14 }
 0x344   : > { %v1283_v19 = vadd.f32 %v1282_v18, %v828_v37 }
 0x346   : > { %2341 = vtanh.f32 %v1283_v19 }
 0x34a   : > { %v2338_v7 = vpop.eup %2337 }
 0x34b   : > { %v1055_v26 = vmul.f32 %v2338_v7, %v1054_v25  ;;  %v2340_v20 = vpop.eup %2339 }
 0x34c   : > { %v1285_v15 = vsub.f32 1.0, %v2340_v20  ;;  %v1287_v30 = vmul.f32 %v2340_v20, %v2906_v0 }
 0x34d   : > { %v1057_v28 = vadd.f32 %v1056_v27, %v1055_v26 }
 0x34f   : > { %1923 = vmatmul.mubr.f32.vlgmr.msra.gmra.mrb[6].mxu1 %v1057_v28  ;;  %1289 = vst [vmem:[#allocation13] sm:$0xff] %v1057_v28 }
 0x350   : > { %v2342_v24 = vpop.eup %2341 }
 0x351   : > { %v1286_v29 = vmul.f32 %v2342_v24, %v1285_v15 }
 0x353   : > { %v1288_v31 = vadd.f32 %v1287_v30, %v1286_v29 }
 0x355   : > { %1888 = vmatmul.mubr.f32.vlgmr.msra.gmra.mrb[8].mxu0 %v1288_v31  ;;  %1290 = vst [vmem:[#allocation13 + $0x8] sm:$0xff] %v1288_v31 }
 0x422   : > { %v1460_v32 = vpop.f32.mrb[6].mxu1 }
 0x423   : > { %v1924_v33 = vpop.f32.mrb[7].mxu1 }
 0x428   : > { %v1390_v34 = vpop.f32.mrb[8].mxu0 }
 0x429   : > { %v1461_v40 = vadd.f32 %v1460_v32, %v1390_v34  ;;  %v1889_v36 = vpop.f32.mrb[9].mxu0 }
 0x42b   : > { %v1471_v37 = vadd.f32 %v1658_v35, %v1461_v40 }
 0x42d   : > { %1472 = vmax.xlane.f32.xlu0 %v1471_v37 }
 0x4ba   : > { %v1473_v38 = vpop.xlane.xlu0 %1472 }
 0x4bb   : > { %v1474_v39 = vsub.f32 %v1471_v37, %v1473_v38  ;;  %vm1483_vm3 = vcmp.eq.f32.partialorder %v1471_v37, %v1473_v38 }
 0x4bc   : > { %v1484_v11 = vsel %vm1483_vm3, %v2881_v23, 128 }
 0x4bd   : > { %v1475_v0 = vmul.f32 1.442695, %v1474_v39  ;;  %v1486_v41 = vshra.s32 %v1484_v11, 16  ;;  %v1485_v44 = vand.u32 65535, %v1484_v11 }
 0x4bf   : > { %2343 = vpow2.f32 %v1475_v0  ;;  %v1488_v42 = vcvt.s32.f32 %v1486_v41  ;;  %v1487_v46 = vcvt.s32.f32 %v1485_v44 }
 0x4c1   : > { %1489 = vmin.xlane.f32.xlu1 %v1488_v42 }
 0x4c9   : > { %v2344_v43 = vpop.eup %2343 }
 0x4ca   : > { %1477 = vadd.xlane.f32.xlu1 %v2344_v43 }
 0x54e   : > { %v2962_v45 = vpop.xlane.xlu1 %1489 }
 0x54f   : > { %vm1491_vm4 = vcmp.eq.f32.partialorder %v1488_v42, %v2962_v45 }
 0x550   : > { %v1492_v47 = vsel %vm1491_vm4, %v1487_v46, inf }
 0x551   : > { %1493 = vmin.xlane.f32.xlu1 %v1492_v47 }
 0x557   : > { %v1478_v48 = vpop.xlane.xlu1 %1477 }
 0x558   : > { %2345 = vlog2.f32 %v1478_v48 }
 0x562   : > { %v2346_v23 = vpop.eup %2345 }
 0x563   : > { %v1480_v49 = vmul.f32 0.6931472, %v2346_v23 }
 0x565   : > { %v1481_v50 = vsub.f32 %v1474_v39, %v1480_v49 }
 0x566   : > { %2500 = shalt.err (!%p2497_p1)
}
 0x567   : > { %s2501_s11 = scalar_lea.hbm %s3049_s9, 256  ;;  %p3088_p6 = pmov %p3087_p3 }
 0x568   : > { %p2502_p5 = scmp.ne.s32.totalorder %s3049_s9, %s2501_s11  ;;  %p2507_p13 = scmp.lt.u32.totalorder %s2501_s11, %s3049_s9 }
 0x56a   : > { %p2503_p9 = pnand %p2502_p5, %p3088_p6 }
 0x56c   : > { %p2504_p10 = pneg %p2503_p9 }
 0x56e   : > { %p2509_p11 = pnand %p2507_p13, %p2504_p10 }
 0x570   : > { %2512 = shalt.err (!%p2509_p11)
}
 0x571   : > { %s2611_s22 = smov 128   ;;  %s2612_s27 = smov 8   ;;  %1482 = vst [vmem:[%s380_s17] sm:$0xff] %v1481_v50 }
 0x572   : > { %p3089_p0 = pmov %p3087_p3  ;;  %s1502_s25 = scalar_lea.sflag [#allocation5], %s378_s21 }
 0x573   : > { %s2513_s4 = scalar_lea.vmem %s2973_s23, 128  ;;  %p3090_p4 = scmp.ne.s32.totalorder %s3068_s19, 0 }
 0x574   : > { %2233 = dma.vmem_to_hbm [thread:$0]  (%p3089_p0), %s1526_s0, 256, %s3049_s9, [#allocation14], %s2611_s22, %s2611_s22, %s2612_s27  }
 0x575   : > { %p2514_p3 = scmp.ne.s32.totalorder %s2973_s23, %s2513_s4  ;;  %s2613_s1 = smov [#allocation12]  }
 0x576   : > { %s2517_s14 = sshll.u32 %s2613_s1, 4  ;;  %s2518_s14 = int_to_ptr.vmem [resolvable:$false] %s2517_s14 }
 0x577   : > { %p2515_p7 = pnand %p2514_p3, %p3090_p4  ;;  %s2519_s11 = scalar_lea.vmem %s2518_s14, 256 }
 0x578   : > { %p2520_p12 = scmp.lt.s32.totalorder %s2973_s23, %s2518_s14  ;;  %p2521_p2 = scmp.lt.s32.totalorder %s2519_s11, %s2513_s4 }
 0x579   : > { %p2516_p8 = pneg %p2515_p7 }
 0x57a   : > { %p2522_p1 = por %p2521_p2, %p2520_p12 }
 0x57c   : > { %p2523_p5 = pnand %p2522_p1, %p2516_p8 }
 0x57e   : > { %2526 = shalt.err (!%p2523_p5)
}
 0x57f   : > { %s2527_s21 = scalar_lea.hbm %s2971_s16, 128  ;;  %s2531_s0 = scalar_lea.hbm %s3048_s8, 1024 }
 0x580   : > { %p2528_p6 = scmp.ne.s32.totalorder %s2971_s16, %s2527_s21  ;;  %p2532_p13 = scmp.lt.u32.totalorder %s2971_s16, %s3048_s8 }
 0x581   : > { %p2533_p11 = scmp.lt.u32.totalorder %s2531_s0, %s2527_s21  ;;  %p2535_p3 = scmp.lt.u32.totalorder %s2527_s21, %s2971_s16 }
 0x582   : > { %p2529_p9 = pnand %p2528_p6, %p3090_p4 }
 0x583   : > { %p2534_p0 = por %p2533_p11, %p2532_p13 }
 0x584   : > { %p2530_p10 = pneg %p2529_p9 }
 0x585   : > { %p2536_p7 = por %p2535_p3, %p2534_p0 }
 0x587   : > { %p2537_p8 = pnand %p2536_p7, %p2530_p10 }
 0x589   : > { %2540 = shalt.err (!%p2537_p8)
}
 0x58a   : > { %2231 = dma.vmem_to_hbm [thread:$0]  (%p3090_p4), %s2973_s23, 128, %s2971_s16, %s1502_s25   ;;  %v1496_v51 = vcvt.f32.s32 %v2962_v45  ;;  %vm1499_vm5 = vcmask 7168  }
 0x58b   : > { %p3091_p12 = scmp.eq.s32.totalorder %s2685_s13, 7 }
 0x58c   : > { %v1497_v53 = vshll.u32 %v1496_v51, 16 }
 0x5de   : > { %v1494_v52 = vpop.xlane.xlu1 %1493 }
 0x5df   : > { %v1495_v54 = vcvt.f32.s32 %v1494_v52 }
 0x5e1   : > { %v1498_v55 = vadd.s32 %v1497_v53, %v1495_v54 }
 0x5e3   : > { %1500 = vst.msk [vmem:[#allocation2] sm:$0xff] %vm1499_vm5, %v1498_v55 }
 0x5e4   : > { %2570 = dma.done.wait (%p3091_p12), [#allocation14], 256   ;;  %p3092_p2 = pmov %p3091_p12 }
 0x5e6   : > { %2572 = vsyncadd (%p3092_p2), [#allocation14], 4294967040 }
 0x5e7 PF: > { %s3093_s19 = sld [smem:[#allocation23_spill]]  ;;  %p2269_p1 = scmp.ge.s32.totalorder %s2591_s12, 2 }
 0x5e8   : > { %s1544_s20 = sand.u32 1, %s2579_s30  }
 0x5e9   : > { %s1545_s23 = scalar_lea.sflag [#allocation5], %s1544_s20 }
 0x5ed   : > { %p3094_p4 = scmp.ne.s32.totalorder %s3093_s19, 0 }
 0x5ef   : > { %p2254_p5 = pnand %p2269_p1, %p3094_p4 }
 0x5f1   : > { %2574 = dma.done.wait (!%p2254_p5), %s1545_s23, 128  }
 0x5f2   : > { %2576 = vsyncadd (!%p2254_p5), %s1545_s23, 4294967168  ;;  %s3095_s12 = sld [smem:[#allocation21_spill]]  ;;  %s3096_s16 = sld [smem:[#allocation20_spill]] }
 0x5f3   : > { %s3097_s11 = sld [smem:[#allocation22_spill]]  ;;  %s3098_s30 = smov %s2583_s10 }
 0x5f8   : > { %p24_p6 = scmp.ge.s32.totalorder %s3095_s12, 10   ;;  %s3099_s10 = smov %s3096_s16 }
 0x5fa   :  { %26 = sbr.rel (!%p24_p6) target bundleno = 11 (0xb), region = 121 }
 0x601   :  { %1550 = vsyncpa [#allocation4], 1 }
 0x602   :  { %1552 = vsyncpa [#allocation4 + $0x1], 1 }
 0x603   :  { %1553 = vsyncpa [#allocation7], 1 }
 0x604   :  { %1554 = vsyncpa [#allocation10], 1 }
 0x605   :  { %1555 = vsyncpa [#allocation5], 1 }
 0x606   :  { %1557 = vsyncpa [#allocation5 + $0x1], 1 }
 0x607   :  { %1558 = vsyncpa [#allocation14], 1 }

</bundles_post_ra>
